<compile_context>
chip_gen: v5e
topology: v5e:2x2
jax: 0.10.0
libtpu: 0.0.40
codegen_flags: <defaults>
</compile_context>

<pallas_src>
import functools
import math

import jax
import jax.numpy as jnp
from jax.experimental import pallas as pl
from jax.experimental.pallas import tpu as pltpu


def _round_up(n, m):
    return ((n + m - 1) // m) * m


def _choose_tm(m_rows):
    """Largest row tile (<=512, multiple of 8) that keeps >=2 grid steps (v7x has 2 TCs)."""
    for cand in (512, 384, 256, 128, 64, 32, 16, 8):
        if m_rows >= 2 * cand:
            return cand
    return 8


def _rational(x, num, den):
    """Grouped rational y = P5(x) / (1 + |Q4(x)|) with per-feature coefficients.

    x:   (tm, D) float32
    num: (6, D)  numerator coefficients a0..a5 (group coefficients pre-expanded per feature)
    den: (4, D)  denominator coefficients b1..b4
    The divide is a multiply by an EUP approximate reciprocal (keeps the VALU slot free).
    """
    a = [num[i:i + 1, :] for i in range(6)]   # coefficient rows sliced once, up front
    b = [den[i:i + 1, :] for i in range(4)]
    p = a[5]
    for i in range(4, -1, -1):                # Horner: a0 + a1 x + ... + a5 x^5
        p = p * x + a[i]
    q = b[3]
    for i in range(2, -1, -1):                # Horner: b1 x + b2 x^2 + b3 x^3 + b4 x^4
        q = q * x + b[i]
    q = q * x
    return p * pl.reciprocal(1.0 + jnp.abs(q), approx=True)


def kan2_kernel(x_ref, w1_ref, b1_ref, w2_ref, b2_ref,
                n1_ref, d1_ref, n2_ref, d2_ref, o_ref, *, skip_param):
    x = x_ref[...]                                                   # (tm, Cp) f32
    h = _rational(x, n1_ref[...], d1_ref[...])                       # act1: identity-init rational
    h = jnp.dot(h.astype(jnp.bfloat16), w1_ref[...],                 # fc1 on MXU, bf16 in, f32 acc
                preferred_element_type=jnp.float32)                  # (tm, Hp)
    h = h + b1_ref[...]
    h = _rational(h, n2_ref[...], d2_ref[...])                       # act2: gelu-init rational (f32)
    y = jnp.dot(h.astype(jnp.bfloat16), w2_ref[...],                 # fc2 on MXU
                preferred_element_type=jnp.float32)                  # (tm, Cp)
    y = y + b2_ref[...]
    # Reload x for the skip rather than keeping the (tm, Cp) tile live across both matmuls
    # and rationals (avoids vreg pressure / spills at large tm).
    o_ref[...] = (y + skip_param * x_ref[...]).astype(o_ref.dtype)   # fused skip connection


def kan2_pallas(x, params, *, skip_param=1.0, tm=None):
    """x: (B, N, C) float.  Returns KAT(x) + skip_param * x, same shape."""
    B, N, C = x.shape
    H = params["w1"].shape[1]
    out_dtype = x.dtype

    M = B * N
    if tm is None:
        tm = _choose_tm(M)
    Mp = _round_up(M, tm)          # remainder rows handled by zero-padding
    Cp = _round_up(C, 128)         # lane-dense feature dims (vreg = 128 lanes)
    Hp = _round_up(H, 128)

    # Zero-padding is exact end-to-end: padded input lanes are 0, padded weight rows/cols,
    # biases and rational coefficients are 0, so padded lanes stay 0 and are sliced off below.
    xt = x.reshape(M, C).astype(jnp.float32)
    xt = jnp.pad(xt, ((0, Mp - M), (0, Cp - C)))

    def pad2(a, r, c):
        return jnp.pad(a, ((0, r - a.shape[0]), (0, c - a.shape[1])))

    w1 = pad2(params["w1"].astype(jnp.bfloat16), Cp, Hp)   # bf16 weights for the MXU
    w2 = pad2(params["w2"].astype(jnp.bfloat16), Hp, Cp)
    b1 = pad2(params["b1"].astype(jnp.float32), 1, Hp)     # biases / coeffs stay f32
    b2 = pad2(params["b2"].astype(jnp.float32), 1, Cp)
    n1 = pad2(params["num1"].astype(jnp.float32), 6, Cp)
    d1 = pad2(params["den1"].astype(jnp.float32), 4, Cp)
    n2 = pad2(params["num2"].astype(jnp.float32), 6, Hp)
    d2 = pad2(params["den2"].astype(jnp.float32), 4, Hp)

    kernel = functools.partial(kan2_kernel, skip_param=float(skip_param))

    yt = pl.pallas_call(
        kernel,
        out_shape=jax.ShapeDtypeStruct((Mp, Cp), jnp.float32),
        grid_spec=pltpu.PrefetchScalarGridSpec(
            num_scalar_prefetch=0,
            grid=(Mp // tm,),
            in_specs=[
                pl.BlockSpec((tm, Cp), lambda i: (i, 0)),   # x tile (pipelined over rows)
                # Grid-invariant blocks below (constant index_map): fetched once, revisited.
                pl.BlockSpec((Cp, Hp), lambda i: (0, 0)),   # fc1 weight (bf16)
                pl.BlockSpec((1, Hp), lambda i: (0, 0)),    # fc1 bias
                pl.BlockSpec((Hp, Cp), lambda i: (0, 0)),   # fc2 weight (bf16)
                pl.BlockSpec((1, Cp), lambda i: (0, 0)),    # fc2 bias
                pl.BlockSpec((6, Cp), lambda i: (0, 0)),    # act1 numerator coeffs
                pl.BlockSpec((4, Cp), lambda i: (0, 0)),    # act1 denominator coeffs
                pl.BlockSpec((6, Hp), lambda i: (0, 0)),    # act2 numerator coeffs
                pl.BlockSpec((4, Hp), lambda i: (0, 0)),    # act2 denominator coeffs
            ],
            out_specs=pl.BlockSpec((tm, Cp), lambda i: (i, 0)),
        ),
        compiler_params=pltpu.CompilerParams(
            dimension_semantics=("parallel",),
            # 48 MiB scoped VMEM: > v5e's 16 MiB default, within v7x's 64 MiB physical budget.
            vmem_limit_bytes=48 * 1024 * 1024,
        ),
    )(xt, w1, b1, w2, b2, n1, d1, n2, d2)

    return yt[:M, :C].reshape(B, N, C).astype(out_dtype)


def _expand_groups(per_group, D):
    """(G, order+1) group coefficients -> (order+1, D) per-feature coefficients."""
    G = per_group.shape[0]
    assert D % G == 0
    return jnp.repeat(per_group, D // G, axis=0).T


def init_params(key, hidden_size, hidden_c, num_groups=8, dtype=jnp.float32):
    kw1, kb1, kw2, kb2 = jax.random.split(key, 4)
    # nn.Linear default init: U(-1/sqrt(fan_in), 1/sqrt(fan_in))
    bound1 = 1.0 / math.sqrt(hidden_size)
    w1 = jax.random.uniform(kw1, (hidden_size, hidden_c), dtype, -bound1, bound1)
    b1 = jax.random.uniform(kb1, (1, hidden_c), dtype, -bound1, bound1)
    bound2 = 1.0 / math.sqrt(hidden_c)
    w2 = jax.random.uniform(kw2, (hidden_c, hidden_size), dtype, -bound2, bound2)
    b2 = jax.random.uniform(kb2, (1, hidden_size), dtype, -bound2, bound2)

    # KAT_Group rational (order 5/4) init coefficients, shared across groups:
    # mode="identity" for act1, mode="gelu" for act2 (values from the KAT repo's init table).
    ident_num = jnp.array([0.0, 1.0, 0.0, 0.0, 0.0, 0.0], dtype)
    ident_den = jnp.array([0.0, 0.0, 0.0, 0.0], dtype)
    gelu_num = jnp.array([-0.0012423594497499122, 0.5080497063245629, 0.41586363182937475,
                          0.13022718688035761, 0.024355900098993424, 0.00290283948155535], dtype)
    gelu_den = jnp.array([-0.06675015696494944, 0.17927646217001553,
                          0.03746682605496631, 1.6561610853276082e-10], dtype)

    num1_g = jnp.tile(ident_num[None, :], (num_groups, 1))   # (G, 6)
    den1_g = jnp.tile(ident_den[None, :], (num_groups, 1))   # (G, 4)
    num2_g = jnp.tile(gelu_num[None, :], (num_groups, 1))
    den2_g = jnp.tile(gelu_den[None, :], (num_groups, 1))

    return {
        "w1": w1, "b1": b1, "w2": w2, "b2": b2,
        "num1": _expand_groups(num1_g, hidden_size),  # (6, C)
        "den1": _expand_groups(den1_g, hidden_size),  # (4, C)
        "num2": _expand_groups(num2_g, hidden_c),     # (6, H)
        "den2": _expand_groups(den2_g, hidden_c),     # (4, H)
    }


def kan2_reference(x, params, skip_param):
    """Pure-JAX f32 reference of the same forward pass."""
    def rat(v, num, den):
        p = num[5]
        for i in range(4, -1, -1):
            p = p * v + num[i]
        q = den[3]
        for i in range(2, -1, -1):
            q = q * v + den[i]
        q = q * v
        return p / (1.0 + jnp.abs(q))

    h = rat(x, params["num1"], params["den1"])
    h = h @ params["w1"] + params["b1"][0]
    h = rat(h, params["num2"], params["den2"])
    y = h @ params["w2"] + params["b2"][0]
    return y + skip_param * x


if __name__ == "__main__":
    B, num_patches, hidden_size, hidden_c = 2, 128, 128, 256
    drop_p = 0.0          # TODO(synk): dropout lowered as eval-mode identity (drop_p treated as 0)
    skip_param = 1.0

    key = jax.random.PRNGKey(0)
    kx, kp = jax.random.split(key)
    x = jax.random.normal(kx, (B, num_patches, hidden_size), jnp.float32)
    params = init_params(kp, hidden_size, hidden_c)

    y = kan2_pallas(x, params, skip_param=skip_param)
    jax.block_until_ready(y)

    y_ref = kan2_reference(x, params, skip_param)
    assert y.shape == x.shape
    max_err = float(jnp.max(jnp.abs(y - y_ref)))
    # Tolerance accounts for bf16 MXU matmuls (f32 accumulation) and the EUP approximate
    # reciprocal vs the pure-f32 reference; observed error is well below this bound.
    if max_err > 5e-2:
        raise AssertionError(f"Pallas kernel mismatch vs reference: max_err={max_err}")
    print("KERNEL_OK")
</pallas_src>

<mosaic_0001>
module attributes {stable_mosaic.version = 11 : i64} {
  func.func @kan2_kernel(%arg0: i32, %arg1: memref<128x128xf32, #tpu.memory_space<vmem>>, %arg2: memref<128x256xbf16, #tpu.memory_space<vmem>>, %arg3: memref<1x256xf32, #tpu.memory_space<vmem>>, %arg4: memref<256x128xbf16, #tpu.memory_space<vmem>>, %arg5: memref<1x128xf32, #tpu.memory_space<vmem>>, %arg6: memref<6x128xf32, #tpu.memory_space<vmem>>, %arg7: memref<4x128xf32, #tpu.memory_space<vmem>>, %arg8: memref<6x256xf32, #tpu.memory_space<vmem>>, %arg9: memref<4x256xf32, #tpu.memory_space<vmem>>, %arg10: memref<128x128xf32, #tpu.memory_space<vmem>>) attributes {dimension_semantics = [#tpu.dimension_semantics<parallel>], iteration_bounds = array<i64: 2>, scalar_prefetch = 0 : i64, scratch_operands = 0 : i64, tpu.core_type = #tpu.core_type<tc>, window_params = [{transform_indices = @transform_0, window_bounds = array<i64: 128, 128>}, {pipeline_mode = #tpu.pipeline_mode<synchronous>, transform_indices = @transform_1, window_bounds = array<i64: 128, 256>}, {pipeline_mode = #tpu.pipeline_mode<synchronous>, transform_indices = @transform_2, window_bounds = array<i64: 1, 256>}, {pipeline_mode = #tpu.pipeline_mode<synchronous>, transform_indices = @transform_3, window_bounds = array<i64: 256, 128>}, {pipeline_mode = #tpu.pipeline_mode<synchronous>, transform_indices = @transform_4, window_bounds = array<i64: 1, 128>}, {pipeline_mode = #tpu.pipeline_mode<synchronous>, transform_indices = @transform_5, window_bounds = array<i64: 6, 128>}, {pipeline_mode = #tpu.pipeline_mode<synchronous>, transform_indices = @transform_6, window_bounds = array<i64: 4, 128>}, {pipeline_mode = #tpu.pipeline_mode<synchronous>, transform_indices = @transform_7, window_bounds = array<i64: 6, 256>}, {pipeline_mode = #tpu.pipeline_mode<synchronous>, transform_indices = @transform_8, window_bounds = array<i64: 4, 256>}, {transform_indices = @transform_9, window_bounds = array<i64: 128, 128>}]} {
    %c0 = arith.constant 0 : index
    %c0_0 = arith.constant 0 : index
    %0 = vector.load %arg1[%c0, %c0_0] : memref<128x128xf32, #tpu.memory_space<vmem>>, vector<128x128xf32>
    %c0_1 = arith.constant 0 : index
    %c0_2 = arith.constant 0 : index
    %1 = vector.load %arg6[%c0_1, %c0_2] : memref<6x128xf32, #tpu.memory_space<vmem>>, vector<6x128xf32>
    %c0_3 = arith.constant 0 : index
    %c0_4 = arith.constant 0 : index
    %2 = vector.load %arg7[%c0_3, %c0_4] : memref<4x128xf32, #tpu.memory_space<vmem>>, vector<4x128xf32>
    %3 = vector.extract_strided_slice %1 {offsets = [0, 0], sizes = [1, 128], strides = [1, 1]} : vector<6x128xf32> to vector<1x128xf32>
    %4 = vector.extract_strided_slice %1 {offsets = [1, 0], sizes = [1, 128], strides = [1, 1]} : vector<6x128xf32> to vector<1x128xf32>
    %5 = vector.extract_strided_slice %1 {offsets = [2, 0], sizes = [1, 128], strides = [1, 1]} : vector<6x128xf32> to vector<1x128xf32>
    %6 = vector.extract_strided_slice %1 {offsets = [3, 0], sizes = [1, 128], strides = [1, 1]} : vector<6x128xf32> to vector<1x128xf32>
    %7 = vector.extract_strided_slice %1 {offsets = [4, 0], sizes = [1, 128], strides = [1, 1]} : vector<6x128xf32> to vector<1x128xf32>
    %8 = vector.extract_strided_slice %1 {offsets = [5, 0], sizes = [1, 128], strides = [1, 1]} : vector<6x128xf32> to vector<1x128xf32>
    %9 = vector.extract_strided_slice %2 {offsets = [0, 0], sizes = [1, 128], strides = [1, 1]} : vector<4x128xf32> to vector<1x128xf32>
    %10 = vector.extract_strided_slice %2 {offsets = [1, 0], sizes = [1, 128], strides = [1, 1]} : vector<4x128xf32> to vector<1x128xf32>
    %11 = vector.extract_strided_slice %2 {offsets = [2, 0], sizes = [1, 128], strides = [1, 1]} : vector<4x128xf32> to vector<1x128xf32>
    %12 = vector.extract_strided_slice %2 {offsets = [3, 0], sizes = [1, 128], strides = [1, 1]} : vector<4x128xf32> to vector<1x128xf32>
    %13 = vector.broadcast %8 : vector<1x128xf32> to vector<128x128xf32>
    %14 = arith.mulf %13, %0 : vector<128x128xf32>
    %15 = vector.broadcast %7 : vector<1x128xf32> to vector<128x128xf32>
    %16 = arith.addf %14, %15 : vector<128x128xf32>
    %17 = arith.mulf %16, %0 : vector<128x128xf32>
    %18 = vector.broadcast %6 : vector<1x128xf32> to vector<128x128xf32>
    %19 = arith.addf %17, %18 : vector<128x128xf32>
    %20 = arith.mulf %19, %0 : vector<128x128xf32>
    %21 = vector.broadcast %5 : vector<1x128xf32> to vector<128x128xf32>
    %22 = arith.addf %20, %21 : vector<128x128xf32>
    %23 = arith.mulf %22, %0 : vector<128x128xf32>
    %24 = vector.broadcast %4 : vector<1x128xf32> to vector<128x128xf32>
    %25 = arith.addf %23, %24 : vector<128x128xf32>
    %26 = arith.mulf %25, %0 : vector<128x128xf32>
    %27 = vector.broadcast %3 : vector<1x128xf32> to vector<128x128xf32>
    %28 = arith.addf %26, %27 : vector<128x128xf32>
    %29 = vector.broadcast %12 : vector<1x128xf32> to vector<128x128xf32>
    %30 = arith.mulf %29, %0 : vector<128x128xf32>
    %31 = vector.broadcast %11 : vector<1x128xf32> to vector<128x128xf32>
    %32 = arith.addf %30, %31 : vector<128x128xf32>
    %33 = arith.mulf %32, %0 : vector<128x128xf32>
    %34 = vector.broadcast %10 : vector<1x128xf32> to vector<128x128xf32>
    %35 = arith.addf %33, %34 : vector<128x128xf32>
    %36 = arith.mulf %35, %0 : vector<128x128xf32>
    %37 = vector.broadcast %9 : vector<1x128xf32> to vector<128x128xf32>
    %38 = arith.addf %36, %37 : vector<128x128xf32>
    %39 = arith.mulf %38, %0 : vector<128x128xf32>
    %40 = math.absf %39 : vector<128x128xf32>
    %cst = arith.constant 1.000000e+00 : f32
    %41 = vector.broadcast %cst : f32 to vector<128x128xf32>
    %42 = arith.addf %41, %40 : vector<128x128xf32>
    %43 = tpu.reciprocal %42 {approx = true} : vector<128x128xf32> -> vector<128x128xf32>
    %44 = arith.mulf %28, %43 : vector<128x128xf32>
    %45 = arith.truncf %44 : vector<128x128xf32> to vector<128x128xbf16>
    %c0_5 = arith.constant 0 : index
    %c0_6 = arith.constant 0 : index
    %46 = vector.load %arg2[%c0_5, %c0_6] : memref<128x256xbf16, #tpu.memory_space<vmem>>, vector<128x256xbf16>
    %cst_7 = arith.constant dense<0.000000e+00> : vector<128x256xf32>
    %47 = tpu.matmul %45, %46, %cst_7 {dimension_numbers = #tpu.dot_dimension_numbers<[1], [0], [0], [1], [0, 0, 1, 1], [], []>} : vector<128x128xbf16>, vector<128x256xbf16>, vector<128x256xf32> -> vector<128x256xf32>
    %c0_8 = arith.constant 0 : index
    %c0_9 = arith.constant 0 : index
    %48 = vector.load %arg3[%c0_8, %c0_9] : memref<1x256xf32, #tpu.memory_space<vmem>>, vector<1x256xf32>
    %49 = vector.broadcast %48 : vector<1x256xf32> to vector<128x256xf32>
    %50 = arith.addf %47, %49 : vector<128x256xf32>
    %c0_10 = arith.constant 0 : index
    %c0_11 = arith.constant 0 : index
    %51 = vector.load %arg8[%c0_10, %c0_11] : memref<6x256xf32, #tpu.memory_space<vmem>>, vector<6x256xf32>
    %c0_12 = arith.constant 0 : index
    %c0_13 = arith.constant 0 : index
    %52 = vector.load %arg9[%c0_12, %c0_13] : memref<4x256xf32, #tpu.memory_space<vmem>>, vector<4x256xf32>
    %53 = vector.extract_strided_slice %51 {offsets = [0, 0], sizes = [1, 256], strides = [1, 1]} : vector<6x256xf32> to vector<1x256xf32>
    %54 = vector.extract_strided_slice %51 {offsets = [1, 0], sizes = [1, 256], strides = [1, 1]} : vector<6x256xf32> to vector<1x256xf32>
    %55 = vector.extract_strided_slice %51 {offsets = [2, 0], sizes = [1, 256], strides = [1, 1]} : vector<6x256xf32> to vector<1x256xf32>
    %56 = vector.extract_strided_slice %51 {offsets = [3, 0], sizes = [1, 256], strides = [1, 1]} : vector<6x256xf32> to vector<1x256xf32>
    %57 = vector.extract_strided_slice %51 {offsets = [4, 0], sizes = [1, 256], strides = [1, 1]} : vector<6x256xf32> to vector<1x256xf32>
    %58 = vector.extract_strided_slice %51 {offsets = [5, 0], sizes = [1, 256], strides = [1, 1]} : vector<6x256xf32> to vector<1x256xf32>
    %59 = vector.extract_strided_slice %52 {offsets = [0, 0], sizes = [1, 256], strides = [1, 1]} : vector<4x256xf32> to vector<1x256xf32>
    %60 = vector.extract_strided_slice %52 {offsets = [1, 0], sizes = [1, 256], strides = [1, 1]} : vector<4x256xf32> to vector<1x256xf32>
    %61 = vector.extract_strided_slice %52 {offsets = [2, 0], sizes = [1, 256], strides = [1, 1]} : vector<4x256xf32> to vector<1x256xf32>
    %62 = vector.extract_strided_slice %52 {offsets = [3, 0], sizes = [1, 256], strides = [1, 1]} : vector<4x256xf32> to vector<1x256xf32>
    %63 = vector.broadcast %58 : vector<1x256xf32> to vector<128x256xf32>
    %64 = arith.mulf %63, %50 : vector<128x256xf32>
    %65 = vector.broadcast %57 : vector<1x256xf32> to vector<128x256xf32>
    %66 = arith.addf %64, %65 : vector<128x256xf32>
    %67 = arith.mulf %66, %50 : vector<128x256xf32>
    %68 = vector.broadcast %56 : vector<1x256xf32> to vector<128x256xf32>
    %69 = arith.addf %67, %68 : vector<128x256xf32>
    %70 = arith.mulf %69, %50 : vector<128x256xf32>
    %71 = vector.broadcast %55 : vector<1x256xf32> to vector<128x256xf32>
    %72 = arith.addf %70, %71 : vector<128x256xf32>
    %73 = arith.mulf %72, %50 : vector<128x256xf32>
    %74 = vector.broadcast %54 : vector<1x256xf32> to vector<128x256xf32>
    %75 = arith.addf %73, %74 : vector<128x256xf32>
    %76 = arith.mulf %75, %50 : vector<128x256xf32>
    %77 = vector.broadcast %53 : vector<1x256xf32> to vector<128x256xf32>
    %78 = arith.addf %76, %77 : vector<128x256xf32>
    %79 = vector.broadcast %62 : vector<1x256xf32> to vector<128x256xf32>
    %80 = arith.mulf %79, %50 : vector<128x256xf32>
    %81 = vector.broadcast %61 : vector<1x256xf32> to vector<128x256xf32>
    %82 = arith.addf %80, %81 : vector<128x256xf32>
    %83 = arith.mulf %82, %50 : vector<128x256xf32>
    %84 = vector.broadcast %60 : vector<1x256xf32> to vector<128x256xf32>
    %85 = arith.addf %83, %84 : vector<128x256xf32>
    %86 = arith.mulf %85, %50 : vector<128x256xf32>
    %87 = vector.broadcast %59 : vector<1x256xf32> to vector<128x256xf32>
    %88 = arith.addf %86, %87 : vector<128x256xf32>
    %89 = arith.mulf %88, %50 : vector<128x256xf32>
    %90 = math.absf %89 : vector<128x256xf32>
    %cst_14 = arith.constant 1.000000e+00 : f32
    %91 = vector.broadcast %cst_14 : f32 to vector<128x256xf32>
    %92 = arith.addf %91, %90 : vector<128x256xf32>
    %93 = tpu.reciprocal %92 {approx = true} : vector<128x256xf32> -> vector<128x256xf32>
    %94 = arith.mulf %78, %93 : vector<128x256xf32>
    %95 = arith.truncf %94 : vector<128x256xf32> to vector<128x256xbf16>
    %c0_15 = arith.constant 0 : index
    %c0_16 = arith.constant 0 : index
    %96 = vector.load %arg4[%c0_15, %c0_16] : memref<256x128xbf16, #tpu.memory_space<vmem>>, vector<256x128xbf16>
    %cst_17 = arith.constant dense<0.000000e+00> : vector<128x128xf32>
    %97 = tpu.matmul %95, %96, %cst_17 {dimension_numbers = #tpu.dot_dimension_numbers<[1], [0], [0], [1], [0, 0, 1, 1], [], []>} : vector<128x256xbf16>, vector<256x128xbf16>, vector<128x128xf32> -> vector<128x128xf32>
    %c0_18 = arith.constant 0 : index
    %c0_19 = arith.constant 0 : index
    %98 = vector.load %arg5[%c0_18, %c0_19] : memref<1x128xf32, #tpu.memory_space<vmem>>, vector<1x128xf32>
    %99 = vector.broadcast %98 : vector<1x128xf32> to vector<128x128xf32>
    %100 = arith.addf %97, %99 : vector<128x128xf32>
    %c0_20 = arith.constant 0 : index
    %c0_21 = arith.constant 0 : index
    %101 = vector.load %arg1[%c0_20, %c0_21] : memref<128x128xf32, #tpu.memory_space<vmem>>, vector<128x128xf32>
    %cst_22 = arith.constant 1.000000e+00 : f32
    %102 = vector.broadcast %cst_22 : f32 to vector<128x128xf32>
    %103 = arith.mulf %102, %101 : vector<128x128xf32>
    %104 = arith.addf %100, %103 : vector<128x128xf32>
    %c0_23 = arith.constant 0 : index
    %c0_24 = arith.constant 0 : index
    %105 = vector.load %arg10[%c0_23, %c0_24] : memref<128x128xf32, #tpu.memory_space<vmem>>, vector<128x128xf32>
    tpu.vector_store %arg10[%c0_23, %c0_24], %104 {strides = array<i32>} : memref<128x128xf32, #tpu.memory_space<vmem>>, vector<128x128xf32>,
    return
  }
  func.func @transform_0(%arg0: i32) -> (i32, i32) {
    %c0_i32 = arith.constant 0 : i32
    %c0_i32_0 = arith.constant 0 : i32
    return %arg0, %c0_i32 : i32, i32
  }
  func.func @transform_1(%arg0: i32) -> (i32, i32) {
    %c0_i32 = arith.constant 0 : i32
    %c0_i32_0 = arith.constant 0 : i32
    %c0_i32_1 = arith.constant 0 : i32
    return %c0_i32, %c0_i32_0 : i32, i32
  }
  func.func @transform_2(%arg0: i32) -> (i32, i32) {
    %c0_i32 = arith.constant 0 : i32
    %c0_i32_0 = arith.constant 0 : i32
    %c0_i32_1 = arith.constant 0 : i32
    return %c0_i32, %c0_i32_0 : i32, i32
  }
  func.func @transform_3(%arg0: i32) -> (i32, i32) {
    %c0_i32 = arith.constant 0 : i32
    %c0_i32_0 = arith.constant 0 : i32
    %c0_i32_1 = arith.constant 0 : i32
    return %c0_i32, %c0_i32_0 : i32, i32
  }
  func.func @transform_4(%arg0: i32) -> (i32, i32) {
    %c0_i32 = arith.constant 0 : i32
    %c0_i32_0 = arith.constant 0 : i32
    %c0_i32_1 = arith.constant 0 : i32
    return %c0_i32, %c0_i32_0 : i32, i32
  }
  func.func @transform_5(%arg0: i32) -> (i32, i32) {
    %c0_i32 = arith.constant 0 : i32
    %c0_i32_0 = arith.constant 0 : i32
    %c0_i32_1 = arith.constant 0 : i32
    return %c0_i32, %c0_i32_0 : i32, i32
  }
  func.func @transform_6(%arg0: i32) -> (i32, i32) {
    %c0_i32 = arith.constant 0 : i32
    %c0_i32_0 = arith.constant 0 : i32
    %c0_i32_1 = arith.constant 0 : i32
    return %c0_i32, %c0_i32_0 : i32, i32
  }
  func.func @transform_7(%arg0: i32) -> (i32, i32) {
    %c0_i32 = arith.constant 0 : i32
    %c0_i32_0 = arith.constant 0 : i32
    %c0_i32_1 = arith.constant 0 : i32
    return %c0_i32, %c0_i32_0 : i32, i32
  }
  func.func @transform_8(%arg0: i32) -> (i32, i32) {
    %c0_i32 = arith.constant 0 : i32
    %c0_i32_0 = arith.constant 0 : i32
    %c0_i32_1 = arith.constant 0 : i32
    return %c0_i32, %c0_i32_0 : i32, i32
  }
  func.func @transform_9(%arg0: i32) -> (i32, i32) {
    %c0_i32 = arith.constant 0 : i32
    %c0_i32_0 = arith.constant 0 : i32
    return %arg0, %c0_i32 : i32, i32
  }
}

</mosaic_0001>

<bundles_post_ra>
// kernel: tpu_custom_call.1
= control target key start
LH: loop header
LB: loop body
LE: loop exit
PB: predicated region body
PF: predicated region fallthrough
CT: control target
= control target key end

     0   :  { %s4346_s0 = inlined_call_operand.hbm [shape: f32[256,128], index: 0, kind: input, shape index: {}]   ;;  %s4347_s1 = inlined_call_operand.hbm [shape: bf16[128,256], index: 1, kind: input, shape index: {}]   ;;  %s4348_s2 = inlined_call_operand.hbm [shape: f32[1,256], index: 2, kind: input, shape index: {}]   ;;  %s4349_s3 = inlined_call_operand.hbm [shape: bf16[256,128], index: 3, kind: input, shape index: {}]   ;;  %s4350_s4 = inlined_call_operand.vmem [shape: f32[1,128], index: 4, kind: input, shape index: {}]   ;;  %s4351_s5 = inlined_call_operand.hbm [shape: f32[6,128], index: 5, kind: input, shape index: {}]   ;;  %s4352_s6 = inlined_call_operand.vmem [shape: f32[4,128], index: 6, kind: input, shape index: {}]   ;;  %s4353_s7 = inlined_call_operand.hbm [shape: f32[6,256], index: 7, kind: input, shape index: {}]   ;;  %s4354_s8 = inlined_call_operand.hbm [shape: f32[4,256], index: 8, kind: input, shape index: {}]   ;;  %s4355_s9 = inlined_call_operand.hbm [shape: f32[256,128], index: 9, kind: output, shape index: {}]  }
   0x1   :  { %4358 = sst [smem:[#allocation20_spill]] %s4347_s1 }
   0x2   :  { %4359 = sst [smem:[#allocation21_spill]] %s4348_s2 }
   0x3   :  { %4360 = sst [smem:[#allocation22_spill]] %s4349_s3 }
   0x4   :  { %4361 = sst [smem:[#allocation23_spill]] %s4351_s5 }
   0x5   :  { %14 = vsyncpa [#allocation3], 0 }
   0x6   :  { %16 = vsyncpa [#allocation3 + $0x1], 0 }
   0x7   :  { %17 = vsyncpa [#allocation6], 0 }
   0x8   :  { %18 = vsyncpa [#allocation9], 0 }
   0x9   :  { %19 = vsyncpa [#allocation12], 0 }
   0xa   :  { %20 = vsyncpa [#allocation4], 0 }
   0xb   :  { %22 = vsyncpa [#allocation4 + $0x1], 0  ;;  %s2920_s30 = smov 0   ;;  %s2922_s10 = smov 0  }
   0xc   :  { %s2924_s11 = smov 0   ;;  %s2926_s12 = smov 0  }
   0xd LB: > { %s4362_s1 = sld [smem:[#allocation20_spill]]  ;;  %s2944_s16 = sadd.s32 4294967295, %s2856_s12   ;;  %s2856_s12 = sphi %s2926_s12, %s4379_s12   ;;  %s2852_s11 = sphi %s2924_s11, %s4378_s11   ;;  %s2848_s10 = sphi %s2922_s10, %s4377_s10   ;;  %s2844_s30 = sphi %s2920_s30, %s4376_s30  }
   0xe   : > { %p2155_p0 = scmp.ge.s32.totalorder %s2856_s12, 1  ;;  %p49_p1 = scmp.eq.s32.totalorder %s2944_s16, 0 }
   0xf   : > { %p253_p2 = scmp.lt.s32.totalorder %s2856_s12, 3  ;;  %s2858_s18 = smov [#allocation5]  }
  0x10   : > { %s266_s19 = sshll.u32 %s2858_s18, 4  ;;  %s4364_s3 = sld [smem:[#allocation22_spill]]  ;;  %s267_s19 = int_to_ptr.vmem [resolvable:$true] %s266_s19 }
  0x11   : > { %p2949_p3 = pnand %p2155_p0, %p253_p2  ;;  %s2859_s24 = smov [#allocation8]  }
  0x12   : > { %s292_s25 = sshll.u32 %s2859_s24, 4  ;;  %s4356_s26 = smov 128   ;;  %s293_s25 = int_to_ptr.vmem [resolvable:$true] %s292_s25 }
  0x13   : > { %s264_s15 = sshll.u32 %s4362_s1, 4  ;;  %p2370_p4 = pneg %p2949_p3  ;;  %s265_s15 = int_to_ptr.hbm [resolvable:$true] %s264_s15 }
  0x14   : > { %s4357_s27 = smov 8   ;;  %s2862_s28 = smov 64  }
  0x15   : > { %p2961_p6 = pnand %p2370_p4, %p49_p1  ;;  %s2863_s29 = smov 4  }
  0x16   : > { %s290_s22 = sshll.u32 %s4364_s3, 4  ;;  %s323_s18 = sshll.u32 %s4353_s7, 4  ;;  %s291_s22 = int_to_ptr.hbm [resolvable:$true] %s290_s22  ;;  %s324_s18 = int_to_ptr.hbm [resolvable:$true] %s323_s18 }
  0x17   : > { %2373 = dma.hbm_to_vmem [thread:$0]  (!%p2961_p6), %s265_s15, 2048, %s267_s19, [#allocation6], %s4356_s26, %s4356_s26, %s4357_s27  }
  0x18   : > { %2379 = dma.hbm_to_vmem [thread:$0]  (!%p2961_p6), %s291_s22, 2048, %s293_s25, [#allocation9], %s2862_s28, %s2862_s28, %s2863_s29  }
  0x19   : > { %s2864_s20 = smov [#allocation11]   ;;  %s4366_s2 = sld [smem:[#allocation21_spill]] }
  0x1a   : > { %s325_s21 = sshll.u32 %s2864_s20, 4  ;;  %s2865_s15 = smov [#allocation7]   ;;  %s326_s21 = int_to_ptr.vmem [resolvable:$true] %s325_s21 }
  0x1b   : > { %2385 = dma.hbm_to_vmem [thread:$0]  (!%p2961_p6), %s324_s18, 256, %s326_s21, [#allocation12]  }
  0x1c   : > { %s281_s19 = sshll.u32 %s2865_s15, 4  ;;  %s4367_s5 = sld [smem:[#allocation23_spill]]  ;;  %s282_s19 = int_to_ptr.vmem [resolvable:$true] %s281_s19 }
  0x1d   : > { %s335_s13 = sshll.u32 %s4354_s8, 4  ;;  %s2866_s14 = smov [#allocation10]   ;;  %s336_s13 = int_to_ptr.hbm [resolvable:$true] %s335_s13 }
  0x1e   : > { %s310_s18 = sshll.u32 %s2866_s14, 4  ;;  %s2867_s20 = smov [#allocation13]   ;;  %s311_s18 = int_to_ptr.vmem [resolvable:$true] %s310_s18 }
  0x1f   : > { %s279_s3 = sshll.u32 %s4366_s2, 4  ;;  %s2154_s21 = sadd.s32 4294967294, %s2856_s12   ;;  %s280_s3 = int_to_ptr.hbm [resolvable:$true] %s279_s3 }
  0x20   : > { %2376 = dma.hbm_to_vmem [thread:$0]  (!%p2961_p6), %s280_s3, 32, %s282_s19, [#allocation6]  }
  0x21   : > { %s337_s3 = sshll.u32 %s2867_s20, 4  ;;  %s2994_s24 = sadd.s32 1, %s2856_s12   ;;  %s338_s3 = int_to_ptr.vmem [resolvable:$true] %s337_s3 }
  0x22   : > { %s308_s28 = sshll.u32 %s4367_s5, 4  ;;  %s32_s15 = ssub.s32 %s2856_s12, %s2994_s24  ;;  %s309_s28 = int_to_ptr.hbm [resolvable:$true] %s308_s28 }
  0x23   : > { %2382 = dma.hbm_to_vmem [thread:$0]  (!%p2961_p6), %s309_s28, 128, %s311_s18, [#allocation9]  }
  0x24   : > { %2388 = dma.hbm_to_vmem [thread:$0]  (!%p2961_p6), %s336_s13, 128, %s338_s3, [#allocation12]  }
  0x25   : > { %s35_s19 = sadd.s32 1, %s2852_s11  ;;  %p33_p7 = scmp.eq.s32.totalorder %s32_s15, 0 }
  0x26   : > { %p42_p8 = scmp.ne.s32.totalorder %s2852_s11, %s2848_s10  ;;  %p43_p9 = scmp.eq.s32.totalorder %s2856_s12, 0 }
  0x27   : > { %p48_p10 = scmp.ne.s32.totalorder %s2848_s10, %s2844_s30  ;;  %p240_p13 = scmp.eq.s32.totalorder %s2944_s16, 1 }
  0x28   : > { %s3005_s22 = scalar_select %p33_p7, %s2852_s11, %s35_s19  }
  0x29   : > { %p3007_p11 = por %p43_p9, %p42_p8  ;;  %p3013_p12 = por %p49_p1, %p48_p10 }
  0x2a   : > { %p246_p0 = scmp.eq.s32.totalorder %s2154_s21, 1  ;;  %p2403_p2 = scmp.lt.s32.totalorder %s2856_s12, 2 }
  0x2b   : > { %s348_s28 = sand.u32 1, %s2852_s11   ;;  %p3020_p4 = por %p240_p13, %p42_p8 }
  0x2c   : > { %p3024_p6 = por %p246_p0, %p48_p10  ;;  %s2163_s13 = sshll.u32 %s348_s28, 7 }
  0x2d   : > { %s2308_s14 = sshll.u32 %s2856_s12, 7  ;;  %s352_s15 = scalar_lea.vmem [#allocation2], %s2163_s13 }
  0x2e   : > { %s357_s3 = scalar_lea.hbm %s4346_s0, %s2308_s14  ;;  %s360_s19 = sshll.u32 %s352_s15, 4  ;;  %s361_s19 = int_to_ptr.vmem [resolvable:$true] %s360_s19 }
  0x2f   : > { %s358_s26 = sshll.u32 %s357_s3, 4  ;;  %p3034_p7 = pnand %p2403_p2, %p3007_p11  ;;  %s359_s26 = int_to_ptr.hbm [resolvable:$true] %s358_s26 }
  0x30   : > { %s349_s27 = scalar_lea.sflag [#allocation3], %s348_s28  ;;  %s2748_s2 = sshra.s32 %s359_s26, 4  ;;  %s2749_s2 = int_to_ptr.hbm [resolvable:$true] %s2748_s2 }
  0x31   : > { %s2750_s5 = scalar_lea.hbm %s2749_s2, 128  ;;  %p2752_p9 = pneg %p3034_p7 }
  0x32   : > { %p2751_p8 = scmp.ne.s32.totalorder %s2749_s2, %s2750_s5  ;;  %s2755_s18 = scalar_lea.hbm %s4346_s0, 256 }
  0x33   : > { %p2756_p11 = scmp.lt.s32.totalorder %s2749_s2, %s4346_s0  ;;  %p2757_p0 = scmp.lt.s32.totalorder %s2755_s18, %s2750_s5 }
  0x34   : > { %p2753_p10 = pnand %p2752_p9, %p2751_p8 }
  0x35   : > { %p2758_p2 = por %p2757_p0, %p2756_p11 }
  0x36   : > { %p2754_p13 = pneg %p2753_p10 }
  0x38   : > { %p2759_p5 = pnand %p2758_p2, %p2754_p13 }
  0x3a   : > { %2762 = shalt.err (!%p2759_p5)
}
  0x3b   : > { %s4373_s28 = smov 8   ;;  %s4374_s3 = smov 128  }
  0x3c   : > { %2392 = dma.hbm_to_vmem [thread:$0]  (!%p3034_p7), %s359_s26, 2048, %s361_s19, %s349_s27, %s4374_s3, %s4374_s3, %s4373_s28  }
  0x3d   : > { %372 = sbr.rel (%p2949_p3) target bundleno = 590 (0x24e), region = 56  ;;  %s3054_s15 = sand.u32 (!%p2949_p3), 1, %s2848_s10  }
  0x3e   : > { %s2167_s2 = sshll.u32 (!%p2949_p3), %s3054_s15, 7  ;;  %s375_s5 = scalar_lea.sflag (!%p2949_p3), [#allocation3], %s3054_s15 }
  0x3f   : > { %s3060_s13 = scalar_lea.vmem (!%p2949_p3), [#allocation2], %s2167_s2 }
  0x42   : > { %2823 = dma.done.wait (%p3013_p12), %s375_s5, 2048  }
  0x43   : > { %2825 = vsyncadd (%p3013_p12), %s375_s5, 4294965248 }
  0x44   : > { %2827 = dma.done.wait (%p49_p1), [#allocation6], 2080  }
  0x45   : > { %2829 = vsyncadd (%p49_p1), [#allocation6], 4294965216 }
  0x46   : > { %2831 = dma.done.wait (%p49_p1), [#allocation9], 2176  }
  0x47   : > { %2833 = vsyncadd (%p49_p1), [#allocation9], 4294965120 }
  0x48   : > { %2835 = dma.done.wait (%p49_p1), [#allocation12], 384  }
  0x49   : > { %2837 = vsyncadd (%p49_p1), [#allocation12], 4294966912  ;;  %v2233_v0 = vld [vmem:[#allocation5 + $0x70] sm:$0xf]  ;;  %v2324_v1 = vld [vmem:[#allocation5 + $0x74] sm:$0xf0] }
  0x4a   : > { %v2323_v2 = vld [vmem:[#allocation5 + $0x74] sm:$0xf]  ;;  %v2234_v3 = vor.u32 %v2324_v1, %v2233_v0  ;;  %v2235_v4 = vld [vmem:[#allocation5 + $0x78] sm:$0xf0]  ;;  %v2225_v5 = vld [vmem:[#allocation5 + $0x60] sm:$0xf] }
  0x4b   : > { %v2322_v6 = vld [vmem:[#allocation5 + $0x64] sm:$0xf0]  ;;  %v2238_v7 = vor.u32 %v2323_v2, %v2235_v4  ;;  %v2321_v8 = vld [vmem:[#allocation5 + $0x64] sm:$0xf]  ;;  %v2227_v9 = vld [vmem:[#allocation5 + $0x68] sm:$0xf0] }
  0x4c   : > { %920 = vmatpush.bf16.msra.mxu0 %v2234_v3  ;;  %v2226_v10 = vor.u32 %v2322_v6, %v2225_v5  ;;  %v2230_v11 = vor.u32 %v2321_v8, %v2227_v9  ;;  %v2217_v12 = vld [vmem:[#allocation5 + $0x50] sm:$0xf]  ;;  %v2320_v13 = vld [vmem:[#allocation5 + $0x54] sm:$0xf0]  ;;  %v2319_v14 = vld [vmem:[#allocation5 + $0x54] sm:$0xf] }
  0x4d   : > { %969 = vmatpush.bf16.msra.mxu1 %v2238_v7  ;;  %v2219_v15 = vld [vmem:[#allocation5 + $0x58] sm:$0xf0]  ;;  %v2209_v16 = vld [vmem:[#allocation5 + $0x40] sm:$0xf]  ;;  %v2318_v17 = vld [vmem:[#allocation5 + $0x44] sm:$0xf0]  ;;  %v2218_v20 = vor.u32 %v2320_v13, %v2217_v12 }
  0x4e   : > { %v2317_v18 = vld [vmem:[#allocation5 + $0x44] sm:$0xf]  ;;  %v2211_v19 = vld [vmem:[#allocation5 + $0x48] sm:$0xf0]  ;;  %v2201_v21 = vld [vmem:[#allocation5 + $0x30] sm:$0xf]  ;;  %v2222_v24 = vor.u32 %v2319_v14, %v2219_v15  ;;  %v2210_v31 = vor.u32 %v2318_v17, %v2209_v16 }
  0x4f   : > { %v2316_v22 = vld [vmem:[#allocation5 + $0x34] sm:$0xf0]  ;;  %v2315_v23 = vld [vmem:[#allocation5 + $0x34] sm:$0xf]  ;;  %v2203_v25 = vld [vmem:[#allocation5 + $0x38] sm:$0xf0]  ;;  %v2214_v35 = vor.u32 %v2317_v18, %v2211_v19 }
  0x50   : > { %921 = vmatpush.bf16.msra.mxu0 %v2226_v10  ;;  %v3078_v26 = vld [vmem:[#allocation5 + $0x20] sm:$0xf]  ;;  %v3080_v27 = vld [vmem:[#allocation5 + $0x24] sm:$0xf0]  ;;  %v3082_v28 = vld [vmem:[#allocation5 + $0x24] sm:$0xf]  ;;  %v2202_v36 = vor.u32 %v2316_v22, %v2201_v21  ;;  %v2206_v37 = vor.u32 %v2315_v23, %v2203_v25 }
  0x51   : > { %970 = vmatpush.bf16.msra.mxu1 %v2230_v11  ;;  %v3084_v29 = vld [vmem:[#allocation5 + $0x28] sm:$0xf0]  ;;  %v3086_v30 = vld [vmem:[#allocation5 + $0x10] sm:$0xf]  ;;  %v3088_v32 = vld [vmem:[#allocation5 + $0x14] sm:$0xf0]  ;;  %v2194_v38 = vor.u32 %v3080_v27, %v3078_v26 }
  0x52   : > { %v3090_v33 = vld [vmem:[#allocation5 + $0x14] sm:$0xf]  ;;  %v3092_v34 = vld [vmem:[#allocation5 + $0x18] sm:$0xf0]  ;;  %v3096_v39 = vld [vmem:[#allocation10] sm:$0x3f]  ;;  %v2198_v41 = vor.u32 %v3082_v28, %v3084_v29  ;;  %v2186_v47 = vor.u32 %v3088_v32, %v3086_v30 }
  0x53   : > { %v463_v40 = vld [vmem:[%s4352_s6] sm:$0xf]  ;;  %v3107_v43 = vld [vmem:[%s3060_s13 + $0x8] sm:$0xff]  ;;  %v3110_v44 = vperm.slane %v3096_v39, 5  ;;  %v3113_v45 = vperm.slane %v3096_v39, 4  ;;  %v3116_v46 = vperm.slane %v3096_v39, 3  ;;  %v2190_v48 = vor.u32 %v3090_v33, %v3092_v34 }
  0x54   : > { %922 = vmatpush.bf16.msra.mxu0 %v2218_v20  ;;  %v3104_v42 = vld [vmem:[%s3060_s13] sm:$0xff]  ;;  %v3122_v49 = vperm.slane %v463_v40, 3  ;;  %v3124_v50 = vperm.slane %v463_v40, 2  ;;  %v3127_v51 = vld [vmem:[%s3060_s13 + $0x10] sm:$0xff]  ;;  %v3130_v52 = vld [vmem:[%s3060_s13 + $0x18] sm:$0xff]  ;;  %v3137_v55 = vperm.slane %v3096_v39, 2 }
  0x55   : > { %971 = vmatpush.bf16.msra.mxu1 %v2222_v24  ;;  %v465_v53 = vmul.f32 %v3110_v44, %v3104_v42  ;;  %v466_v54 = vmul.f32 %v3110_v44, %v3107_v43  ;;  %v3139_v56 = vperm.slane %v463_v40, 1  ;;  %v467_v59 = vmul.f32 %v3110_v44, %v3127_v51  ;;  %v2177_v29 = vld [vmem:[#allocation5] sm:$0xf]  ;;  %v3214_v34 = vld [vmem:[%s3060_s13 + $0x28] sm:$0xff]  ;;  %s4259_s19 = scalar_lea.vmem [#allocation14], %s2167_s2  ;;  %s2341_s21 = sshll.u32 %s2944_s16, 7 }
  0x56   : > { %v631_v57 = vmul.f32 %v3122_v49, %v3104_v42  ;;  %v632_v58 = vmul.f32 %v3122_v49, %v3107_v43  ;;  %v468_v60 = vmul.f32 %v3110_v44, %v3130_v52  ;;  %v633_v63 = vmul.f32 %v3122_v49, %v3127_v51  ;;  %v3211_v33 = vld [vmem:[%s3060_s13 + $0x20] sm:$0xff]  ;;  %s2020_s20 = scalar_lea.hbm %s4355_s9, %s2341_s21  ;;  %s2021_s25 = sshll.u32 %s4259_s19, 4  ;;  %s2022_s25 = int_to_ptr.vmem [resolvable:$true] %s2021_s25 }
  0x57   : > { %v482_v61 = vadd.f32 %v3113_v45, %v465_v53  ;;  %v483_v62 = vadd.f32 %v3113_v45, %v466_v54  ;;  %v634_v0 = vmul.f32 %v3122_v49, %v3130_v52  ;;  %v484_v3 = vadd.f32 %v3113_v45, %v467_v59  ;;  %v2179_v53 = vld [vmem:[#allocation5 + $0x8] sm:$0xf0]  ;;  %s2023_s28 = sshll.u32 %s2020_s20, 4  ;;  %s2009_s16 = scalar_lea.sflag [#allocation4], %s3054_s15  ;;  %s2024_s28 = int_to_ptr.hbm [resolvable:$true] %s2023_s28 }
  0x58   : > { %923 = vmatpush.bf16.msra.mxu0 %v2210_v31  ;;  %v648_v1 = vadd.f32 %v3124_v50, %v631_v57  ;;  %v649_v2 = vadd.f32 %v3124_v50, %v632_v58  ;;  %v485_v4 = vadd.f32 %v3113_v45, %v468_v60  ;;  %v650_v7 = vadd.f32 %v3124_v50, %v633_v63  ;;  %v2310_v31 = vld [vmem:[#allocation5 + $0x4] sm:$0xf0]  ;;  %s2792_s3 = sshra.s32 %s2024_s28, 4  ;;  %s2798_s26 = scalar_lea.hbm %s4355_s9, 256  ;;  %s2793_s3 = int_to_ptr.hbm [resolvable:$true] %s2792_s3 }
  0x59   : > { %972 = vmatpush.bf16.msra.mxu1 %v2214_v35  ;;  %v498_v5 = vmul.f32 %v482_v61, %v3104_v42  ;;  %v499_v6 = vmul.f32 %v483_v62, %v3107_v43  ;;  %v651_v8 = vadd.f32 %v3124_v50, %v634_v0  ;;  %v500_v11 = vmul.f32 %v484_v3, %v3127_v51  ;;  %s2794_s2 = scalar_lea.hbm %s2793_s3, 128  ;;  %p2799_p12 = scmp.lt.s32.totalorder %s2793_s3, %s4355_s9 }
  0x5a   : > { %v664_v9 = vmul.f32 %v648_v1, %v3104_v42  ;;  %v665_v10 = vmul.f32 %v649_v2, %v3107_v43  ;;  %v501_v12 = vmul.f32 %v485_v4, %v3130_v52  ;;  %v666_v15 = vmul.f32 %v650_v7, %v3127_v51  ;;  %p2795_p1 = scmp.ne.s32.totalorder %s2793_s3, %s2794_s2  ;;  %p2800_p7 = scmp.lt.s32.totalorder %s2798_s26, %s2794_s2 }
  0x5b   : > { %v515_v13 = vadd.f32 %v3116_v46, %v498_v5  ;;  %v516_v14 = vadd.f32 %v3116_v46, %v499_v6  ;;  %v667_v16 = vmul.f32 %v651_v8, %v3130_v52  ;;  %v3172_v17 = vperm.slane %v3096_v39, 1 }
  0x5c   : > { %924 = vmatpush.bf16.msra.mxu0 %v2202_v36  ;;  %v681_v18 = vadd.f32 %v3139_v56, %v664_v9  ;;  %v682_v19 = vadd.f32 %v3139_v56, %v665_v10  ;;  %v3176_v20 = vperm.slane %v463_v40, 0  ;;  %v683_v23 = vadd.f32 %v3139_v56, %v666_v15  ;;  %p2796_p3 = pnand %p2795_p1, %p3020_p4  ;;  %p2801_p8 = por %p2800_p7, %p2799_p12 }
  0x5d   : > { %973 = vmatpush.bf16.msra.mxu1 %v2206_v37  ;;  %v531_v21 = vmul.f32 %v515_v13, %v3104_v42  ;;  %v532_v22 = vmul.f32 %v516_v14, %v3107_v43  ;;  %v684_v24 = vadd.f32 %v3139_v56, %v667_v16  ;;  %v517_v27 = vadd.f32 %v3116_v46, %v500_v11 }
  0x5e   : > { %v697_v25 = vmul.f32 %v681_v18, %v3104_v42  ;;  %v698_v26 = vmul.f32 %v682_v19, %v3107_v43  ;;  %v518_v28 = vadd.f32 %v3116_v46, %v501_v12  ;;  %v699_v37 = vmul.f32 %v683_v23, %v3127_v51  ;;  %v3240_v23 = vld [vmem:[%s3060_s13 + $0x38] sm:$0xff]  ;;  %p2797_p5 = pneg %p2796_p3 }
  0x5f   : > { %v548_v35 = vadd.f32 %v3137_v55, %v531_v21  ;;  %v549_v36 = vadd.f32 %v3137_v55, %v532_v22  ;;  %v700_v40 = vmul.f32 %v684_v24, %v3130_v52  ;;  %v2178_v60 = vor.u32 %v2310_v31, %v2177_v29  ;;  %v3237_v22 = vld [vmem:[%s3060_s13 + $0x30] sm:$0xff] }
  0x60   : > { %925 = vmatpush.bf16.msra.mxu0 %v2194_v38  ;;  %v2309_v38 = vld [vmem:[#allocation5 + $0x4] sm:$0xf]  ;;  %v714_v54 = vadd.f32 %v3176_v20, %v697_v25  ;;  %v715_v57 = vadd.f32 %v3176_v20, %v698_v26  ;;  %v716_v59 = vadd.f32 %v3176_v20, %v699_v37  ;;  %v533_v2 = vmul.f32 %v517_v27, %v3127_v51  ;;  %p2802_p9 = pnand %p2801_p8, %p2797_p5 }
  0x61   : > { %974 = vmatpush.bf16.msra.mxu1 %v2198_v41  ;;  %v564_v58 = vmul.f32 %v548_v35, %v3104_v42  ;;  %v565_v41 = vmul.f32 %v549_v36, %v3107_v43  ;;  %v717_v63 = vadd.f32 %v3176_v20, %v700_v40  ;;  %v2182_v0 = vor.u32 %v2309_v38, %v2179_v53 }
  0x62   : > { %v730_v61 = vmul.f32 %v714_v54, %v3104_v42  ;;  %v731_v62 = vmul.f32 %v715_v57, %v3107_v43  ;;  %v534_v30 = vmul.f32 %v518_v28, %v3130_v52  ;;  %v732_v4 = vmul.f32 %v716_v59, %v3127_v51 }
  0x63   : > { %v581_v1 = vadd.f32 %v3172_v17, %v564_v58  ;;  %v582_v32 = vadd.f32 %v3172_v17, %v565_v41  ;;  %v733_v7 = vmul.f32 %v717_v63, %v3130_v52  ;;  %v3218_v8 = vperm.slane %v3096_v39, 0 }
  0x64   : > { %926 = vmatpush.bf16.msra.mxu0 %v2186_v47  ;;  %v746_v47 = vand.u32 2147483647, %v730_v61  ;;  %v747_v3 = vand.u32 2147483647, %v731_v62  ;;  %v550_v9 = vadd.f32 %v3137_v55, %v533_v2  ;;  %v551_v10 = vadd.f32 %v3137_v55, %v534_v30 }
  0x65   : > { %975 = vmatpush.bf16.msra.mxu1 %v2190_v48  ;;  %v597_v48 = vmul.f32 %v581_v1, %v3104_v42  ;;  %v598_v11 = vmul.f32 %v582_v32, %v3107_v43  ;;  %v748_v12 = vand.u32 2147483647, %v732_v4  ;;  %v469_v13 = vmul.f32 %v3110_v44, %v3211_v33 }
  0x66   : > { %v762_v5 = vadd.f32 1.0, %v746_v47  ;;  %v763_v6 = vadd.f32 1.0, %v747_v3  ;;  %v470_v42 = vmul.f32 %v3110_v44, %v3214_v34  ;;  %v635_v39 = vmul.f32 %v3122_v49, %v3211_v33 }
  0x67   : > { %v636_v14 = vmul.f32 %v3122_v49, %v3214_v34  ;;  %v749_v15 = vand.u32 2147483647, %v733_v7  ;;  %v486_v16 = vadd.f32 %v3113_v45, %v469_v13  ;;  %v614_v43 = vadd.f32 %v3218_v8, %v597_v48 }
  0x68   : > { %927 = vmatpush.bf16.msra.mxu0 %v2178_v60  ;;  %2456 = vrcp.f32 %v762_v5  ;;  %v487_v18 = vadd.f32 %v3113_v45, %v470_v42  ;;  %v652_v19 = vadd.f32 %v3124_v50, %v635_v39  ;;  %v615_v24 = vadd.f32 %v3218_v8, %v598_v11 }
  0x69   : > { %976 = vmatpush.bf16.msra.mxu1 %v2182_v0  ;;  %2458 = vrcp.f32 %v763_v6  ;;  %v653_v21 = vadd.f32 %v3124_v50, %v636_v14  ;;  %v566_v25 = vmul.f32 %v550_v9, %v3127_v51  ;;  %v567_v26 = vmul.f32 %v551_v10, %v3130_v52 }
  0x6a   : > { %v502_v27 = vmul.f32 %v486_v16, %v3211_v33  ;;  %v764_v28 = vadd.f32 1.0, %v748_v12  ;;  %v503_v29 = vmul.f32 %v487_v18, %v3214_v34  ;;  %v668_v31 = vmul.f32 %v652_v19, %v3211_v33 }
  0x6b   : > { %v669_v35 = vmul.f32 %v653_v21, %v3214_v34  ;;  %v765_v37 = vadd.f32 1.0, %v749_v15  ;;  %v637_v40 = vmul.f32 %v3122_v49, %v3237_v22  ;;  %v638_v38 = vmul.f32 %v3122_v49, %v3240_v23 }
  0x6c   : > { %v519_v57 = vadd.f32 %v3116_v46, %v502_v27  ;;  %v685_v58 = vadd.f32 %v3139_v56, %v668_v31  ;;  %v583_v60 = vadd.f32 %v3172_v17, %v566_v25  ;;  %v584_v61 = vadd.f32 %v3172_v17, %v567_v26  ;;  %v3289_v27 = vld [vmem:[%s3060_s13 + $0x40] sm:$0xff] }
  0x6d   : > { %v686_v41 = vadd.f32 %v3139_v56, %v669_v35  ;;  %v520_v62 = vadd.f32 %v3116_v46, %v503_v29  ;;  %2460 = vrcp.f32 %v764_v28  ;;  %v471_v1 = vmul.f32 %v3110_v44, %v3237_v22  ;;  %v3293_v35 = vld [vmem:[%s3060_s13 + $0x48] sm:$0xff] }
  0x6e   : > { %v2457_v36 = vpop.eup %2456  ;;  %v701_v63 = vmul.f32 %v685_v58, %v3211_v33  ;;  %2462 = vrcp.f32 %v765_v37  ;;  %v472_v30 = vmul.f32 %v3110_v44, %v3240_v23  ;;  %v654_v32 = vadd.f32 %v3124_v50, %v637_v40 }
  0x6f   : > { %v2459_v53 = vpop.eup %2458  ;;  %v794_v54 = vmul.f32 %v2457_v36, %v614_v43  ;;  %v702_v0 = vmul.f32 %v686_v41, %v3214_v34  ;;  %v535_v47 = vmul.f32 %v519_v57, %v3211_v33  ;;  %v655_v5 = vadd.f32 %v3124_v50, %v638_v38 }
  0x70   : > { %v795_v59 = vmul.f32 %v2459_v53, %v615_v24  ;;  %v718_v3 = vadd.f32 %v3176_v20, %v701_v63  ;;  %v599_v6 = vmul.f32 %v583_v60, %v3127_v51  ;;  %v600_v7 = vmul.f32 %v584_v61, %v3130_v52 }
  0x71   : > { %v719_v4 = vadd.f32 %v3176_v20, %v702_v0  ;;  %v536_v48 = vmul.f32 %v520_v62, %v3214_v34  ;;  %v488_v9 = vadd.f32 %v3113_v45, %v471_v1  ;;  %v489_v11 = vadd.f32 %v3113_v45, %v472_v30 }
  0x72   : > { %v810_v2 = vpack.c.bf16 %v795_v59, %v794_v54  ;;  %v734_v10 = vmul.f32 %v718_v3, %v3211_v33  ;;  %v670_v12 = vmul.f32 %v654_v32, %v3237_v22  ;;  %v552_v42 = vadd.f32 %v3137_v55, %v535_v47 }
  0x73   : > { %v2461_v13 = vpop.eup %2460  ;;  %v735_v39 = vmul.f32 %v719_v4, %v3214_v34  ;;  %v671_v51 = vmul.f32 %v655_v5, %v3240_v23  ;;  %v616_v14 = vadd.f32 %v3218_v8, %v599_v6  ;;  %v617_v15 = vadd.f32 %v3218_v8, %v600_v7 }
  0x74   : > { %928 = vmatmul.bf16.vlgmr.msra.gmra.mxu0 %v810_v2  ;;  %977 = vmatmul.bf16.vlgmr.msra.gmra.mxu1 %v810_v2  ;;  %v2463_v52 = vpop.eup %2462  ;;  %v553_v16 = vadd.f32 %v3137_v55, %v536_v48  ;;  %v504_v43 = vmul.f32 %v488_v9, %v3237_v22  ;;  %v750_v18 = vand.u32 2147483647, %v734_v10  ;;  %v505_v19 = vmul.f32 %v489_v11, %v3240_v23 }
  0x75   : > { %v687_v21 = vadd.f32 %v3139_v56, %v670_v12  ;;  %v568_v24 = vmul.f32 %v552_v42, %v3211_v33  ;;  %v751_v25 = vand.u32 2147483647, %v735_v39  ;;  %v688_v26 = vadd.f32 %v3139_v56, %v671_v51  ;;  %v3329_v51 = vld [vmem:[%s3060_s13 + $0x50] sm:$0xff] }
  0x76   : > { %v796_v28 = vmul.f32 %v2461_v13, %v616_v14  ;;  %v797_v29 = vmul.f32 %v2463_v52, %v617_v15  ;;  %v569_v31 = vmul.f32 %v553_v16, %v3214_v34  ;;  %v521_v36 = vadd.f32 %v3116_v46, %v504_v43 }
  0x77   : > { %v766_v37 = vadd.f32 1.0, %v750_v18  ;;  %v522_v40 = vadd.f32 %v3116_v46, %v505_v19  ;;  %v703_v38 = vmul.f32 %v687_v21, %v3237_v22  ;;  %v639_v53 = vmul.f32 %v3122_v49, %v3289_v27 }
  0x78   : > { %v585_v54 = vadd.f32 %v3172_v17, %v568_v24  ;;  %v767_v57 = vadd.f32 1.0, %v751_v25  ;;  %v704_v58 = vmul.f32 %v688_v26, %v3240_v23  ;;  %v640_v41 = vmul.f32 %v3122_v49, %v3293_v35  ;;  %v3337_v24 = vld [vmem:[%s3060_s13 + $0x58] sm:$0xff] }
  0x79   : > { %v811_v59 = vpack.c.bf16 %v797_v29, %v796_v28  ;;  %v586_v60 = vadd.f32 %v3172_v17, %v569_v31  ;;  %v537_v61 = vmul.f32 %v521_v36, %v3237_v22  ;;  %2464 = vrcp.f32 %v766_v37 }
  0x7a   : > { %v538_v62 = vmul.f32 %v522_v40, %v3240_v23  ;;  %v720_v63 = vadd.f32 %v3176_v20, %v703_v38  ;;  %v656_v0 = vadd.f32 %v3124_v50, %v639_v53  ;;  %v601_v1 = vmul.f32 %v585_v54, %v3211_v33 }
  0x7b   : > { %2466 = vrcp.f32 %v767_v57  ;;  %v721_v2 = vadd.f32 %v3176_v20, %v704_v58  ;;  %v657_v30 = vadd.f32 %v3124_v50, %v640_v41  ;;  %v602_v32 = vmul.f32 %v586_v60, %v3214_v34 }
  0x7c   : > { %v473_v47 = vmul.f32 %v3110_v44, %v3289_v27  ;;  %v474_v3 = vmul.f32 %v3110_v44, %v3293_v35  ;;  %v736_v4 = vmul.f32 %v720_v63, %v3237_v22  ;;  %v672_v33 = vmul.f32 %v656_v0, %v3289_v27 }
  0x7d   : > { %v554_v5 = vadd.f32 %v3137_v55, %v537_v61  ;;  %v555_v6 = vadd.f32 %v3137_v55, %v538_v62  ;;  %v737_v7 = vmul.f32 %v721_v2, %v3240_v23  ;;  %v673_v48 = vmul.f32 %v657_v30, %v3293_v35 }
  0x7e   : > { %v618_v9 = vadd.f32 %v3218_v8, %v601_v1  ;;  %v619_v10 = vadd.f32 %v3218_v8, %v602_v32  ;;  %v490_v11 = vadd.f32 %v3113_v45, %v473_v47  ;;  %v491_v12 = vadd.f32 %v3113_v45, %v474_v3 }
  0x7f   : > { %v2465_v34 = vpop.eup %2464  ;;  %v752_v42 = vand.u32 2147483647, %v736_v4  ;;  %v689_v39 = vadd.f32 %v3139_v56, %v672_v33  ;;  %v570_v52 = vmul.f32 %v554_v5, %v3237_v22  ;;  %v571_v14 = vmul.f32 %v555_v6, %v3240_v23 }
  0x80   : > { %v753_v15 = vand.u32 2147483647, %v737_v7  ;;  %v690_v16 = vadd.f32 %v3139_v56, %v673_v48  ;;  %v798_v43 = vmul.f32 %v2465_v34, %v618_v9  ;;  %v506_v19 = vmul.f32 %v490_v11, %v3289_v27 }
  0x81   : > { %v2467_v13 = vpop.eup %2466  ;;  %v507_v21 = vmul.f32 %v491_v12, %v3293_v35  ;;  %v641_v25 = vmul.f32 %v3122_v49, %v3329_v51  ;;  %v768_v26 = vadd.f32 1.0, %v752_v42  ;;  %v705_v28 = vmul.f32 %v689_v39, %v3289_v27 }
  0x82   : > { %v799_v18 = vmul.f32 %v2467_v13, %v619_v10  ;;  %v587_v29 = vadd.f32 %v3172_v17, %v570_v52  ;;  %v769_v31 = vadd.f32 1.0, %v753_v15  ;;  %v706_v36 = vmul.f32 %v690_v16, %v3293_v35  ;;  %v3376_v13 = vld [vmem:[%s3060_s13 + $0x60] sm:$0xff]  ;;  %v3381_v15 = vld [vmem:[%s3060_s13 + $0x68] sm:$0xff] }
  0x83   : > { %v642_v37 = vmul.f32 %v3122_v49, %v3337_v24  ;;  %v588_v38 = vadd.f32 %v3172_v17, %v571_v14  ;;  %v523_v53 = vadd.f32 %v3116_v46, %v506_v19  ;;  %v524_v54 = vadd.f32 %v3116_v46, %v507_v21 }
  0x84   : > { %933 = vmatmul.bf16.gmra.mxu0 %v811_v59  ;;  %982 = vmatmul.bf16.gmra.mxu1 %v811_v59  ;;  %v812_v40 = vpack.c.bf16 %v799_v18, %v798_v43  ;;  %v658_v57 = vadd.f32 %v3124_v50, %v641_v25  ;;  %2468 = vrcp.f32 %v768_v26  ;;  %v722_v58 = vadd.f32 %v3176_v20, %v705_v28 }
  0x85   : > { %v475_v41 = vmul.f32 %v3110_v44, %v3329_v51  ;;  %v476_v59 = vmul.f32 %v3110_v44, %v3337_v24  ;;  %v603_v60 = vmul.f32 %v587_v29, %v3237_v22  ;;  %2470 = vrcp.f32 %v769_v31 }
  0x86   : > { %v723_v61 = vadd.f32 %v3176_v20, %v706_v36  ;;  %v659_v62 = vadd.f32 %v3124_v50, %v642_v37  ;;  %v604_v63 = vmul.f32 %v588_v38, %v3240_v23  ;;  %v539_v0 = vmul.f32 %v523_v53, %v3289_v27 }
  0x87   : > { %v540_v1 = vmul.f32 %v524_v54, %v3293_v35  ;;  %v674_v2 = vmul.f32 %v658_v57, %v3329_v51  ;;  %v738_v30 = vmul.f32 %v722_v58, %v3289_v27  ;;  %v492_v32 = vadd.f32 %v3113_v45, %v475_v41 }
  0x88   : > { %v493_v22 = vadd.f32 %v3113_v45, %v476_v59  ;;  %v739_v47 = vmul.f32 %v723_v61, %v3293_v35  ;;  %v675_v3 = vmul.f32 %v659_v62, %v3337_v24  ;;  %v620_v23 = vadd.f32 %v3218_v8, %v603_v60 }
  0x89   : > { %v621_v33 = vadd.f32 %v3218_v8, %v604_v63  ;;  %v556_v5 = vadd.f32 %v3137_v55, %v539_v0  ;;  %v557_v6 = vadd.f32 %v3137_v55, %v540_v1  ;;  %v691_v48 = vadd.f32 %v3139_v56, %v674_v2 }
  0x8a   : > { %v2469_v4 = vpop.eup %2468  ;;  %v754_v34 = vand.u32 2147483647, %v738_v30  ;;  %v508_v9 = vmul.f32 %v492_v32, %v3329_v51  ;;  %v509_v10 = vmul.f32 %v493_v22, %v3337_v24  ;;  %v755_v11 = vand.u32 2147483647, %v739_v47 }
  0x8b   : > { %v2471_v7 = vpop.eup %2470  ;;  %v692_v12 = vadd.f32 %v3139_v56, %v675_v3  ;;  %v800_v42 = vmul.f32 %v2469_v4, %v620_v23  ;;  %v572_v52 = vmul.f32 %v556_v5, %v3289_v27  ;;  %v573_v14 = vmul.f32 %v557_v6, %v3293_v35 }
  0x8c   : > { %v801_v39 = vmul.f32 %v2471_v7, %v621_v33  ;;  %v707_v16 = vmul.f32 %v691_v48, %v3329_v51  ;;  %v770_v43 = vadd.f32 1.0, %v754_v34  ;;  %v525_v18 = vadd.f32 %v3116_v46, %v508_v9  ;;  %v3421_v48 = vld [vmem:[%s3060_s13 + $0x70] sm:$0xff] }
  0x8d   : > { %v526_v19 = vadd.f32 %v3116_v46, %v509_v10  ;;  %v643_v21 = vmul.f32 %v3122_v49, %v3376_v13  ;;  %v771_v25 = vadd.f32 1.0, %v755_v11  ;;  %v708_v26 = vmul.f32 %v692_v12, %v3337_v24  ;;  %v3425_v11 = vld [vmem:[%s3060_s13 + $0x78] sm:$0xff] }
  0x8e   : > { %v644_v28 = vmul.f32 %v3122_v49, %v3381_v15  ;;  %v813_v29 = vpack.c.bf16 %v801_v39, %v800_v42  ;;  %v589_v31 = vadd.f32 %v3172_v17, %v572_v52  ;;  %v590_v36 = vadd.f32 %v3172_v17, %v573_v14 }
  0x8f   : > { %v724_v37 = vadd.f32 %v3176_v20, %v707_v16  ;;  %2472 = vrcp.f32 %v770_v43  ;;  %v542_v38 = vmul.f32 %v526_v19, %v3337_v24  ;;  %v660_v53 = vadd.f32 %v3124_v50, %v643_v21 }
  0x90   : > { %2474 = vrcp.f32 %v771_v25  ;;  %v725_v54 = vadd.f32 %v3176_v20, %v708_v26  ;;  %v477_v57 = vmul.f32 %v3110_v44, %v3376_v13  ;;  %v661_v58 = vadd.f32 %v3124_v50, %v644_v28 }
  0x91   : > { %v605_v41 = vmul.f32 %v589_v31, %v3289_v27  ;;  %v606_v59 = vmul.f32 %v590_v36, %v3293_v35  ;;  %v478_v60 = vmul.f32 %v3110_v44, %v3381_v15  ;;  %v740_v61 = vmul.f32 %v724_v37, %v3329_v51 }
  0x92   : > { %v559_v63 = vadd.f32 %v3137_v55, %v542_v38  ;;  %v676_v0 = vmul.f32 %v660_v53, %v3376_v13  ;;  %v741_v1 = vmul.f32 %v725_v54, %v3337_v24  ;;  %v494_v2 = vadd.f32 %v3113_v45, %v477_v57 }
  0x93   : > { %v677_v27 = vmul.f32 %v661_v58, %v3381_v15  ;;  %v622_v35 = vadd.f32 %v3218_v8, %v605_v41  ;;  %v623_v32 = vadd.f32 %v3218_v8, %v606_v59  ;;  %v495_v22 = vadd.f32 %v3113_v45, %v478_v60 }
  0x94   : > { %938 = vmatmul.bf16.gmra.mxu0 %v812_v40  ;;  %987 = vmatmul.bf16.gmra.mxu1 %v812_v40  ;;  %v541_v40 = vmul.f32 %v525_v18, %v3329_v51  ;;  %v756_v3 = vand.u32 2147483647, %v740_v61  ;;  %v575_v23 = vmul.f32 %v559_v63, %v3337_v24  ;;  %v693_v33 = vadd.f32 %v3139_v56, %v676_v0 }
  0x95   : > { %v2473_v30 = vpop.eup %2472  ;;  %v757_v5 = vand.u32 2147483647, %v741_v1  ;;  %v510_v6 = vmul.f32 %v494_v2, %v3376_v13  ;;  %v694_v7 = vadd.f32 %v3139_v56, %v677_v27  ;;  %v511_v10 = vmul.f32 %v495_v22, %v3381_v15 }
  0x96   : > { %v558_v62 = vadd.f32 %v3137_v55, %v541_v40  ;;  %v2475_v47 = vpop.eup %2474  ;;  %v802_v34 = vmul.f32 %v2473_v30, %v622_v35  ;;  %v772_v12 = vadd.f32 1.0, %v756_v3  ;;  %v592_v39 = vadd.f32 %v3172_v17, %v575_v23 }
  0x97   : > { %v803_v9 = vmul.f32 %v2475_v47, %v623_v32  ;;  %v709_v52 = vmul.f32 %v693_v33, %v3376_v13  ;;  %v645_v14 = vmul.f32 %v3122_v49, %v3421_v48  ;;  %v773_v16 = vadd.f32 1.0, %v757_v5 }
  0x98   : > { %v574_v4 = vmul.f32 %v558_v62, %v3329_v51  ;;  %v527_v43 = vadd.f32 %v3116_v46, %v510_v6  ;;  %v710_v18 = vmul.f32 %v694_v7, %v3381_v15  ;;  %v646_v19 = vmul.f32 %v3122_v49, %v3425_v11 }
  0x99   : > { %v814_v21 = vpack.c.bf16 %v803_v9, %v802_v34  ;;  %v528_v25 = vadd.f32 %v3116_v46, %v511_v10  ;;  %2476 = vrcp.f32 %v772_v12  ;;  %v608_v28 = vmul.f32 %v592_v39, %v3337_v24 }
  0x9a   : > { %v591_v42 = vadd.f32 %v3172_v17, %v574_v4  ;;  %v662_v31 = vadd.f32 %v3124_v50, %v645_v14  ;;  %2478 = vrcp.f32 %v773_v16  ;;  %v543_v36 = vmul.f32 %v527_v43, %v3376_v13 }
  0x9b   : > { %v727_v37 = vadd.f32 %v3176_v20, %v710_v18  ;;  %v663_v40 = vadd.f32 %v3124_v50, %v646_v19  ;;  %v544_v49 = vmul.f32 %v528_v25, %v3381_v15  ;;  %v480_v24 = vmul.f32 %v3110_v44, %v3425_v11 }
  0x9c   : > { %v607_v26 = vmul.f32 %v591_v42, %v3329_v51  ;;  %v479_v51 = vmul.f32 %v3110_v44, %v3421_v48  ;;  %v678_v53 = vmul.f32 %v662_v31, %v3421_v48  ;;  %v560_v58 = vadd.f32 %v3137_v55, %v543_v36 }
  0x9d   : > { %v743_v50 = vmul.f32 %v727_v37, %v3381_v15  ;;  %v679_v41 = vmul.f32 %v663_v40, %v3425_v11  ;;  %v625_v59 = vadd.f32 %v3218_v8, %v608_v28  ;;  %v561_v60 = vadd.f32 %v3137_v55, %v544_v49 }
  0x9e   : > { %v624_v57 = vadd.f32 %v3218_v8, %v607_v26  ;;  %v496_v61 = vadd.f32 %v3113_v45, %v479_v51  ;;  %v497_v44 = vadd.f32 %v3113_v45, %v480_v24  ;;  %v695_v0 = vadd.f32 %v3139_v56, %v678_v53  ;;  %v2332_v53 = vld [vmem:[#allocation8 + $0x38] sm:$0xff] }
  0x9f   : > { %v2477_v54 = vpop.eup %2476  ;;  %v576_v2 = vmul.f32 %v560_v58, %v3376_v13  ;;  %v759_v27 = vand.u32 2147483647, %v743_v50  ;;  %v696_v30 = vadd.f32 %v3139_v56, %v679_v41  ;;  %v577_v32 = vmul.f32 %v561_v60, %v3381_v15  ;;  %1878 = vmatpush.bf16.msra.mxu2 %v2332_v53  ;;  %v2331_v58 = vld [vmem:[#allocation8 + $0x30] sm:$0xff]  ;;  %v2338_v60 = vld [vmem:[#allocation8 + $0x68] sm:$0xff] }
  0xa0   : > { %v2479_v62 = vpop.eup %2478  ;;  %v804_v1 = vmul.f32 %v2477_v54, %v624_v57  ;;  %v512_v22 = vmul.f32 %v496_v61, %v3421_v48  ;;  %v513_v47 = vmul.f32 %v497_v44, %v3425_v11  ;;  %v711_v45 = vmul.f32 %v695_v0, %v3421_v48  ;;  %v2340_v54 = vld [vmem:[#allocation8 + $0x78] sm:$0xff]  ;;  %v2337_v61 = vld [vmem:[#allocation8 + $0x60] sm:$0xff]  ;;  %v2335_v0 = vld [vmem:[#allocation8 + $0x50] sm:$0xff] }
  0xa1   : > { %v805_v35 = vmul.f32 %v2479_v62, %v625_v59  ;;  %v593_v4 = vadd.f32 %v3172_v17, %v576_v2  ;;  %v775_v23 = vadd.f32 1.0, %v759_v27  ;;  %v712_v33 = vmul.f32 %v696_v30, %v3425_v11  ;;  %1927 = vmatpush.bf16.msra.mxu3 %v2340_v54  ;;  %v2336_v44 = vld [vmem:[#allocation8 + $0x58] sm:$0xff]  ;;  %v3491_v30 = vld [vmem:[#allocation11] sm:$0x3f] }
  0xa2   : > { %v594_v6 = vadd.f32 %v3172_v17, %v577_v32  ;;  %v529_v56 = vadd.f32 %v3116_v46, %v512_v22  ;;  %v530_v7 = vadd.f32 %v3116_v46, %v513_v47  ;;  %v728_v34 = vadd.f32 %v3176_v20, %v711_v45  ;;  %v1020_v62 = vld [vmem:[#allocation13] sm:$0xff]  ;;  %v3493_v32 = vld [vmem:[#allocation11 + $0x8] sm:$0x3f]  ;;  %v2326_v45 = vld [vmem:[#allocation8 + $0x8] sm:$0xff] }
  0xa3   : > { %v815_v5 = vpack.c.bf16 %v805_v35, %v804_v1  ;;  %v609_v9 = vmul.f32 %v593_v4, %v3376_v13  ;;  %v729_v10 = vadd.f32 %v3176_v20, %v712_v33  ;;  %1879 = vmatpush.bf16.msra.mxu2 %v2331_v58  ;;  %v834_v1 = vld [vmem:[#allocation7] sm:$0x3]  ;;  %v1354_v2 = vperm.slane %v1020_v62, 3  ;;  %v2334_v4 = vld [vmem:[#allocation8 + $0x48] sm:$0xff] }
  0xa4   : > { %943 = vmatmul.bf16.gmra.mxu0 %v813_v29  ;;  %992 = vmatmul.bf16.gmra.mxu1 %v813_v29  ;;  %v726_v29 = vadd.f32 %v3176_v20, %v709_v52  ;;  %v610_v12 = vmul.f32 %v594_v6, %v3381_v15  ;;  %v545_v42 = vmul.f32 %v529_v56, %v3421_v48  ;;  %v1355_v27 = vperm.slane %v1020_v62, 7 }
  0xa5   : > { %v546_v39 = vmul.f32 %v530_v7, %v3425_v11  ;;  %v744_v52 = vmul.f32 %v728_v34, %v3421_v48  ;;  %v745_v46 = vmul.f32 %v729_v10, %v3425_v11  ;;  %v626_v16 = vadd.f32 %v3218_v8, %v609_v9 }
  0xa6   : > { %v742_v38 = vmul.f32 %v726_v29, %v3376_v13  ;;  %v627_v13 = vadd.f32 %v3218_v8, %v610_v12  ;;  %v562_v43 = vadd.f32 %v3137_v55, %v545_v42  ;;  %v1392_v35 = vperm.slane %v1020_v62, 2  ;;  %v2325_v42 = vld [vmem:[#allocation8] sm:$0xff] }
  0xa7   : > { %v563_v20 = vadd.f32 %v3137_v55, %v546_v39  ;;  %v760_v19 = vand.u32 2147483647, %v744_v52  ;;  %v761_v15 = vand.u32 2147483647, %v745_v46  ;;  %v3495_v22 = vperm.slane %v834_v1, 0  ;;  %v2333_v39 = vld [vmem:[#allocation8 + $0x40] sm:$0xff] }
  0xa8   : > { %v758_v63 = vand.u32 2147483647, %v742_v38  ;;  %v578_v26 = vmul.f32 %v562_v43, %v3421_v48  ;;  %v3497_v47 = vperm.slane %v834_v1, 1  ;;  %v3502_v33 = vperm.slane %v1354_v2, 3 }
  0xa9   : > { %v579_v28 = vmul.f32 %v563_v20, %v3425_v11  ;;  %v776_v29 = vadd.f32 1.0, %v760_v19  ;;  %v777_v31 = vadd.f32 1.0, %v761_v15  ;;  %v3507_v6 = vperm.slane %v1355_v27, 3 }
  0xaa   : > { %v774_v3 = vadd.f32 1.0, %v758_v63  ;;  %v595_v37 = vadd.f32 %v3172_v17, %v578_v26  ;;  %v2327_v63 = vld [vmem:[#allocation8 + $0x10] sm:$0xff]  ;;  %v3510_v34 = vperm.slane %v3491_v30, 4  ;;  %v3512_v9 = vperm.slane %v1392_v35, 2 }
  0xab   : > { %v596_v40 = vadd.f32 %v3172_v17, %v579_v28  ;;  %v2339_v17 = vld [vmem:[#allocation8 + $0x70] sm:$0xff]  ;;  %v1462_v52 = vperm.slane %v1020_v62, 1  ;;  %v3521_v46 = vperm.slane %v3493_v32, 4  ;;  %v3534_v19 = vperm.slane %v3491_v30, 3 }
  0xac   : > { %2480 = vrcp.f32 %v774_v3  ;;  %v611_v55 = vmul.f32 %v595_v37, %v3421_v48  ;;  %1928 = vmatpush.bf16.msra.mxu3 %v2339_v17  ;;  %v2330_v48 = vld [vmem:[#allocation8 + $0x28] sm:$0xff]  ;;  %v1393_v3 = vperm.slane %v1020_v62, 6  ;;  %v1532_v15 = vperm.slane %v1020_v62, 0 }
  0xad   : > { %2482 = vrcp.f32 %v775_v23  ;;  %v612_v49 = vmul.f32 %v596_v40, %v3425_v11  ;;  %1880 = vmatpush.bf16.msra.mxu2 %v2330_v48  ;;  %v2329_v11 = vld [vmem:[#allocation8 + $0x20] sm:$0xff]  ;;  %v3500_v23 = vperm.slane %v3491_v30, 5  ;;  %v3538_v28 = vperm.slane %v1462_v52, 1 }
  0xae   : > { %2484 = vrcp.f32 %v776_v29  ;;  %v628_v24 = vadd.f32 %v3218_v8, %v611_v55  ;;  %v3549_v55 = vperm.slane %v3491_v30, 2  ;;  %v3553_v53 = vperm.slane %v1532_v15, 0 }
  0xaf   : > { %2486 = vrcp.f32 %v777_v31  ;;  %v629_v38 = vadd.f32 %v3218_v8, %v612_v49  ;;  %v2328_v8 = vld [vmem:[#allocation8 + $0x18] sm:$0xff]  ;;  %v3542_v31 = vperm.slane %v3493_v32, 3  ;;  %v3556_v54 = vperm.slane %v3493_v32, 2 }
  0xb0   : > { %1929 = vmatpush.bf16.msra.mxu3 %v2338_v60  ;;  %v3570_v48 = vperm.slane %v3491_v30, 1 }
  0xb1   : > { %1881 = vmatpush.bf16.msra.mxu2 %v2329_v11  ;;  %v3574_v11 = vperm.slane %v3493_v32, 1 }
  0xb2   : > { %v2481_v14 = vpop.eup %2480 }
  0xb3   : > { %v2483_v18 = vpop.eup %2482 }
  0xb4   : > { %948 = vmatmul.bf16.gmra.mxu0 %v814_v21  ;;  %997 = vmatmul.bf16.gmra.mxu1 %v814_v21  ;;  %v806_v21 = vmul.f32 %v2481_v14, %v626_v16  ;;  %v807_v25 = vmul.f32 %v2483_v18, %v627_v13  ;;  %v2485_v51 = vpop.eup %2484  ;;  %v3523_v14 = vperm.slane %v1393_v3, 2  ;;  %v1463_v16 = vperm.slane %v1020_v62, 5 }
  0xb5   : > { %v2487_v57 = vpop.eup %2486  ;;  %v808_v50 = vmul.f32 %v2485_v51, %v628_v24  ;;  %1930 = vmatpush.bf16.msra.mxu3 %v2337_v61  ;;  %1882 = vmatpush.bf16.msra.mxu2 %v2328_v8 }
  0xb6   : > { %v816_v36 = vpack.c.bf16 %v807_v25, %v806_v21  ;;  %v809_v41 = vmul.f32 %v2487_v57, %v629_v38  ;;  %v1533_v21 = vperm.slane %v1020_v62, 4  ;;  %v3545_v37 = vperm.slane %v1463_v16, 1 }
  0xb8   : > { %v817_v59 = vpack.c.bf16 %v809_v41, %v808_v50  ;;  %v3559_v58 = vperm.slane %v1533_v21, 0 }
  0xb9   : > { %1931 = vmatpush.bf16.msra.mxu3 %v2336_v44  ;;  %1883 = vmatpush.bf16.msra.mxu2 %v2327_v63 }
  0xbd   : > { %1932 = vmatpush.bf16.msra.mxu3 %v2335_v0  ;;  %1884 = vmatpush.bf16.msra.mxu2 %v2326_v45 }
  0xc1   : > { %1933 = vmatpush.bf16.msra.mxu3 %v2334_v4  ;;  %1885 = vmatpush.bf16.msra.mxu2 %v2325_v42 }
  0xc4   : > { %953 = vmatmul.bf16.gmra.mxu0 %v815_v5  ;;  %1002 = vmatmul.bf16.gmra.mxu1 %v815_v5  ;;  %v3505_v5 = vperm.slane %v3493_v32, 5 }
  0xc5   : > { %1934 = vmatpush.bf16.msra.mxu3 %v2333_v39 }
  0xd4   : > { %958 = vmatmul.bf16.gmra.mxu0 %v816_v36  ;;  %1007 = vmatmul.bf16.gmra.mxu1 %v816_v36 }
  0xe4   : > { %963 = vmatmul.bf16.gmra.mxu0 %v817_v59  ;;  %1012 = vmatmul.bf16.gmra.mxu1 %v817_v59 }
  0xf1   : > { %v929_v56 = vpop.f32.mrf.mxu0  ;;  %v978_v7 = vpop.f32.mrf.mxu1 }
  0xf2   : > { %v3515_v10 = vadd.f32 %v929_v56, %v3495_v22  ;;  %v3518_v12 = vadd.f32 %v978_v7, %v3497_v47 }
  0xf4   : > { %v1023_v13 = vmul.f32 %v3500_v23, %v3515_v10  ;;  %v1360_v43 = vmul.f32 %v3502_v33, %v3515_v10  ;;  %v1024_v20 = vmul.f32 %v3505_v5, %v3518_v12  ;;  %v1361_v18 = vmul.f32 %v3507_v6, %v3518_v12 }
  0xf6   : > { %v1057_v25 = vadd.f32 %v3510_v34, %v1023_v13  ;;  %v1398_v26 = vadd.f32 %v3512_v9, %v1360_v43  ;;  %v1058_v29 = vadd.f32 %v3521_v46, %v1024_v20  ;;  %v1399_v36 = vadd.f32 %v3523_v14, %v1361_v18 }
  0xf8   : > { %v1089_v40 = vmul.f32 %v1057_v25, %v3515_v10  ;;  %v1430_v49 = vmul.f32 %v1398_v26, %v3515_v10  ;;  %v1090_v51 = vmul.f32 %v1058_v29, %v3518_v12  ;;  %v1431_v57 = vmul.f32 %v1399_v36, %v3518_v12 }
  0xf9   : > { %v931_v24 = vpop.f32.mrf.mxu0  ;;  %v980_v38 = vpop.f32.mrf.mxu1 }
  0xfa   : > { %v3562_v17 = vadd.f32 %v931_v24, %v3495_v22  ;;  %v3565_v50 = vadd.f32 %v980_v38, %v3497_v47  ;;  %v1123_v41 = vadd.f32 %v3534_v19, %v1089_v40  ;;  %v1468_v59 = vadd.f32 %v3538_v28, %v1430_v49 }
  0xfb   : > { %v1124_v60 = vadd.f32 %v3542_v31, %v1090_v51  ;;  %v1469_v61 = vadd.f32 %v3545_v37, %v1431_v57  ;;  %v3611_v49 = vperm.slane %v3491_v30, 0 }
  0xfc   : > { %v1025_v8 = vmul.f32 %v3500_v23, %v3562_v17  ;;  %v1155_v44 = vmul.f32 %v1123_v41, %v3515_v10  ;;  %v1362_v62 = vmul.f32 %v3502_v33, %v3562_v17  ;;  %v1500_v63 = vmul.f32 %v1468_v59, %v3515_v10 }
  0xfd   : > { %v1026_v0 = vmul.f32 %v3505_v5, %v3565_v50  ;;  %v1156_v1 = vmul.f32 %v1124_v60, %v3518_v12  ;;  %v1363_v2 = vmul.f32 %v3507_v6, %v3565_v50  ;;  %v1501_v27 = vmul.f32 %v1469_v61, %v3518_v12 }
  0xfe   : > { %v1059_v35 = vadd.f32 %v3510_v34, %v1025_v8  ;;  %v1189_v3 = vadd.f32 %v3549_v55, %v1155_v44  ;;  %v1400_v45 = vadd.f32 %v3512_v9, %v1362_v62  ;;  %v1538_v4 = vadd.f32 %v3553_v53, %v1500_v63 }
  0xff   : > { %v1060_v56 = vadd.f32 %v3521_v46, %v1026_v0  ;;  %v1190_v7 = vadd.f32 %v3556_v54, %v1156_v1  ;;  %v1401_v42 = vadd.f32 %v3523_v14, %v1363_v2  ;;  %v1539_v39 = vadd.f32 %v3559_v58, %v1501_v27 }
 0x100   : > { %v1091_v52 = vmul.f32 %v1059_v35, %v3562_v17  ;;  %v1221_v16 = vmul.f32 %v1189_v3, %v3515_v10  ;;  %v1432_v13 = vmul.f32 %v1400_v45, %v3562_v17  ;;  %v1570_v43 = vmul.f32 %v1538_v4, %v3515_v10 }
 0x101   : > { %v934_v20 = vpop.f32.mrf.mxu0  ;;  %v983_v18 = vpop.f32.mrf.mxu1  ;;  %v1092_v15 = vmul.f32 %v1060_v56, %v3565_v50  ;;  %v1222_v21 = vmul.f32 %v1190_v7, %v3518_v12  ;;  %v1433_v25 = vmul.f32 %v1401_v42, %v3565_v50  ;;  %v1571_v26 = vmul.f32 %v1539_v39, %v3518_v12 }
 0x102   : > { %v3606_v29 = vadd.f32 %v934_v20, %v3495_v22  ;;  %v1125_v36 = vadd.f32 %v3534_v19, %v1091_v52  ;;  %v1255_v40 = vadd.f32 %v3570_v48, %v1221_v16  ;;  %v1470_v51 = vadd.f32 %v3538_v28, %v1432_v13 }
 0x103   : > { %v1602_v24 = vand.u32 2147483647, %v1570_v43  ;;  %v1126_v38 = vadd.f32 %v3542_v31, %v1092_v15  ;;  %v1256_v57 = vadd.f32 %v3574_v11, %v1222_v21  ;;  %v1471_v60 = vadd.f32 %v3545_v37, %v1433_v25 }
 0x104   : > { %v1157_v41 = vmul.f32 %v1125_v36, %v3562_v17  ;;  %v1287_v59 = vmul.f32 %v1255_v40, %v3515_v10  ;;  %v1603_v61 = vand.u32 2147483647, %v1571_v26  ;;  %v1502_v8 = vmul.f32 %v1470_v51, %v3562_v17 }
 0x105   : > { %v1634_v44 = vadd.f32 1.0, %v1602_v24  ;;  %v1158_v30 = vmul.f32 %v1126_v38, %v3565_v50  ;;  %v3622_v62 = vperm.slane %v3493_v32, 0  ;;  %v3625_v63 = vadd.f32 %v983_v18, %v3497_v47 }
 0x106   : > { %v1191_v0 = vadd.f32 %v3549_v55, %v1157_v41  ;;  %v1503_v1 = vmul.f32 %v1471_v60, %v3565_v50  ;;  %v1635_v2 = vadd.f32 1.0, %v1603_v61  ;;  %v1540_v10 = vadd.f32 %v3553_v53, %v1502_v8 }
 0x107   : > { %2488 = vrcp.f32 %v1634_v44  ;;  %v1192_v27 = vadd.f32 %v3556_v54, %v1158_v30  ;;  %v1288_v35 = vmul.f32 %v1256_v57, %v3518_v12  ;;  %v1321_v32 = vadd.f32 %v3611_v49, %v1287_v59 }
 0x108   : > { %v1223_v3 = vmul.f32 %v1191_v0, %v3562_v17  ;;  %v1541_v45 = vadd.f32 %v3559_v58, %v1503_v1  ;;  %v1027_v4 = vmul.f32 %v3500_v23, %v3606_v29  ;;  %v1572_v42 = vmul.f32 %v1540_v10, %v3562_v17 }
 0x109   : > { %v936_v56 = vpop.f32.mrf.mxu0  ;;  %v985_v7 = vpop.f32.mrf.mxu1  ;;  %v1224_v39 = vmul.f32 %v1192_v27, %v3565_v50  ;;  %2490 = vrcp.f32 %v1635_v2  ;;  %v1364_v52 = vmul.f32 %v3502_v33, %v3606_v29  ;;  %v1028_v43 = vmul.f32 %v3505_v5, %v3625_v63 }
 0x10a   : > { %v3642_v12 = vadd.f32 %v936_v56, %v3495_v22  ;;  %v1257_v16 = vadd.f32 %v3570_v48, %v1223_v3  ;;  %v1573_v13 = vmul.f32 %v1541_v45, %v3565_v50  ;;  %v1604_v20 = vand.u32 2147483647, %v1572_v42 }
 0x10b   : > { %v1258_v18 = vadd.f32 %v3574_v11, %v1224_v39  ;;  %v1061_v15 = vadd.f32 %v3510_v34, %v1027_v4  ;;  %v1402_v21 = vadd.f32 %v3512_v9, %v1364_v52  ;;  %v3657_v24 = vadd.f32 %v985_v7, %v3497_v47 }
 0x10c   : > { %v1289_v25 = vmul.f32 %v1257_v16, %v3562_v17  ;;  %v1605_v26 = vand.u32 2147483647, %v1573_v13  ;;  %v1029_v36 = vmul.f32 %v3500_v23, %v3642_v12  ;;  %v1366_v40 = vmul.f32 %v3502_v33, %v3642_v12 }
 0x10d   : > { %v2489_v51 = vpop.eup %2488  ;;  %v1636_v38 = vadd.f32 1.0, %v1604_v20  ;;  %v1093_v57 = vmul.f32 %v1061_v15, %v3606_v29  ;;  %v1434_v41 = vmul.f32 %v1402_v21, %v3606_v29  ;;  %v1290_v59 = vmul.f32 %v1258_v18, %v3565_v50 }
 0x10e   : > { %v1322_v17 = vadd.f32 %v3622_v62, %v1288_v35  ;;  %v1637_v60 = vadd.f32 1.0, %v1605_v26  ;;  %v1063_v61 = vadd.f32 %v3510_v34, %v1029_v36  ;;  %v1323_v44 = vadd.f32 %v3611_v49, %v1289_v25 }
 0x10f   : > { %v2491_v8 = vpop.eup %2490  ;;  %2492 = vrcp.f32 %v1636_v38  ;;  %v1698_v30 = vmul.f32 %v2489_v51, %v1321_v32  ;;  %v1127_v0 = vadd.f32 %v3534_v19, %v1093_v57  ;;  %v1404_v2 = vadd.f32 %v3512_v9, %v1366_v40 }
 0x110   : > { %2494 = vrcp.f32 %v1637_v60  ;;  %v1095_v1 = vmul.f32 %v1063_v61, %v3642_v12  ;;  %v1472_v10 = vadd.f32 %v3538_v28, %v1434_v41  ;;  %v1030_v3 = vmul.f32 %v3505_v5, %v3657_v24 }
 0x111   : > { %v939_v50 = vpop.f32.mrf.mxu0  ;;  %v988_v27 = vpop.f32.mrf.mxu1  ;;  %v1159_v35 = vmul.f32 %v1127_v0, %v3606_v29  ;;  %v1062_v45 = vadd.f32 %v3521_v46, %v1028_v43  ;;  %v1365_v32 = vmul.f32 %v3507_v6, %v3625_v63  ;;  %v1324_v4 = vadd.f32 %v3622_v62, %v1290_v59 }
 0x112   : > { %v1699_v56 = vmul.f32 %v2491_v8, %v1322_v17  ;;  %v1129_v7 = vadd.f32 %v3534_v19, %v1095_v1  ;;  %v1436_v42 = vmul.f32 %v1404_v2, %v3642_v12  ;;  %v1504_v52 = vmul.f32 %v1472_v10, %v3606_v29 }
 0x113   : > { %v1193_v39 = vadd.f32 %v3549_v55, %v1159_v35  ;;  %v1064_v16 = vadd.f32 %v3521_v46, %v1030_v3  ;;  %v1094_v13 = vmul.f32 %v1062_v45, %v3625_v63  ;;  %v1367_v18 = vmul.f32 %v3507_v6, %v3657_v24 }
 0x114   : > { %v1161_v43 = vmul.f32 %v1129_v7, %v3642_v12  ;;  %v1474_v20 = vadd.f32 %v3538_v28, %v1436_v42  ;;  %v1403_v15 = vadd.f32 %v3523_v14, %v1365_v32  ;;  %v1542_v26 = vadd.f32 %v3553_v53, %v1504_v52 }
 0x115   : > { %v2493_v21 = vpop.eup %2492  ;;  %v1225_v25 = vmul.f32 %v1193_v39, %v3606_v29  ;;  %v1096_v36 = vmul.f32 %v1064_v16, %v3657_v24  ;;  %v1128_v40 = vadd.f32 %v3542_v31, %v1094_v13  ;;  %v1405_v59 = vadd.f32 %v3523_v14, %v1367_v18 }
 0x116   : > { %v2495_v51 = vpop.eup %2494  ;;  %v1700_v38 = vmul.f32 %v2493_v21, %v1323_v44  ;;  %v1195_v57 = vadd.f32 %v3549_v55, %v1161_v43  ;;  %v1506_v41 = vmul.f32 %v1474_v20, %v3642_v12  ;;  %v1574_v61 = vmul.f32 %v1542_v26, %v3606_v29 }
 0x117   : > { %v1701_v17 = vmul.f32 %v2495_v51, %v1324_v4  ;;  %v1259_v60 = vadd.f32 %v3570_v48, %v1225_v25  ;;  %v1130_v8 = vadd.f32 %v3542_v31, %v1096_v36  ;;  %v1160_v44 = vmul.f32 %v1128_v40, %v3625_v63 }
 0x118   : > { %v1730_v0 = vpack.c.bf16 %v1700_v38, %v1698_v30  ;;  %v1227_v1 = vmul.f32 %v1195_v57, %v3642_v12  ;;  %v1544_v2 = vadd.f32 %v3553_v53, %v1506_v41  ;;  %v3701_v10 = vadd.f32 %v939_v50, %v3495_v22 }
 0x119   : > { %v941_v35 = vpop.f32.mrf.mxu0  ;;  %v990_v3 = vpop.f32.mrf.mxu1  ;;  %v1731_v45 = vpack.c.bf16 %v1701_v17, %v1699_v56  ;;  %v1606_v32 = vand.u32 2147483647, %v1574_v61  ;;  %v1162_v4 = vmul.f32 %v1130_v8, %v3657_v24  ;;  %v3705_v7 = vadd.f32 %v988_v27, %v3497_v47 }
 0x11a   : > { %1886 = vmatmul.bf16.vlgmr.msra.gmra.mxu2 %v1730_v0  ;;  %v1261_v30 = vadd.f32 %v3570_v48, %v1227_v1  ;;  %v1576_v42 = vmul.f32 %v1544_v2, %v3642_v12  ;;  %v3710_v39 = vadd.f32 %v941_v35, %v3495_v22  ;;  %v1194_v52 = vadd.f32 %v3556_v54, %v1160_v44 }
 0x11b   : > { %1935 = vmatmul.bf16.vlgmr.msra.gmra.mxu3 %v1731_v45  ;;  %v1638_v50 = vadd.f32 1.0, %v1606_v32  ;;  %v1196_v56 = vadd.f32 %v3556_v54, %v1162_v4  ;;  %v1291_v16 = vmul.f32 %v1259_v60, %v3606_v29  ;;  %v1435_v27 = vmul.f32 %v1403_v15, %v3625_v63 }
 0x11c   : > { %v1608_v13 = vand.u32 2147483647, %v1576_v42  ;;  %v1437_v43 = vmul.f32 %v1405_v59, %v3657_v24  ;;  %v1226_v20 = vmul.f32 %v1194_v52, %v3625_v63  ;;  %v1031_v21 = vmul.f32 %v3500_v23, %v3701_v10 }
 0x11d   : > { %2496 = vrcp.f32 %v1638_v50  ;;  %v1228_v18 = vmul.f32 %v1196_v56, %v3657_v24  ;;  %v1293_v25 = vmul.f32 %v1261_v30, %v3642_v12  ;;  %v1473_v36 = vadd.f32 %v3545_v37, %v1435_v27 }
 0x11e   : > { %v1640_v26 = vadd.f32 1.0, %v1608_v13  ;;  %v1475_v29 = vadd.f32 %v3545_v37, %v1437_v43  ;;  %v1260_v40 = vadd.f32 %v3574_v11, %v1226_v20  ;;  %v1033_v51 = vmul.f32 %v3500_v23, %v3710_v39 }
 0x11f   : > { %v1262_v15 = vadd.f32 %v3574_v11, %v1228_v18  ;;  %v1065_v38 = vadd.f32 %v3510_v34, %v1031_v21  ;;  %v3730_v57 = vadd.f32 %v990_v3, %v3497_v47  ;;  %v1505_v12 = vmul.f32 %v1473_v36, %v3625_v63 }
 0x120   : > { %2498 = vrcp.f32 %v1640_v26  ;;  %v1507_v41 = vmul.f32 %v1475_v29, %v3657_v24  ;;  %v1325_v60 = vadd.f32 %v3611_v49, %v1291_v16  ;;  %v1067_v61 = vadd.f32 %v3510_v34, %v1033_v51 }
 0x121   : > { %v944_v59 = vpop.f32.mrf.mxu0  ;;  %v993_v17 = vpop.f32.mrf.mxu1  ;;  %v1097_v8 = vmul.f32 %v1065_v38, %v3701_v10  ;;  %v1368_v0 = vmul.f32 %v3502_v33, %v3701_v10  ;;  %v1327_v1 = vadd.f32 %v3611_v49, %v1293_v25  ;;  %v1292_v2 = vmul.f32 %v1260_v40, %v3625_v63 }
 0x122   : > { %v1543_v44 = vadd.f32 %v3559_v58, %v1505_v12  ;;  %v1545_v35 = vadd.f32 %v3559_v58, %v1507_v41  ;;  %v3744_v45 = vadd.f32 %v944_v59, %v3495_v22  ;;  %v1294_v32 = vmul.f32 %v1262_v15, %v3657_v24 }
 0x123   : > { %v2497_v3 = vpop.eup %2496  ;;  %v1099_v4 = vmul.f32 %v1067_v61, %v3710_v39  ;;  %v1131_v30 = vadd.f32 %v3534_v19, %v1097_v8  ;;  %v1370_v56 = vmul.f32 %v3502_v33, %v3710_v39  ;;  %v1406_v27 = vadd.f32 %v3512_v9, %v1368_v0 }
 0x124   : > { %v1702_v42 = vmul.f32 %v2497_v3, %v1325_v60  ;;  %v1575_v50 = vmul.f32 %v1543_v44, %v3625_v63  ;;  %v1577_v52 = vmul.f32 %v1545_v35, %v3657_v24  ;;  %v1032_v43 = vmul.f32 %v3505_v5, %v3705_v7 }
 0x125   : > { %v1133_v16 = vadd.f32 %v3534_v19, %v1099_v4  ;;  %v1163_v13 = vmul.f32 %v1131_v30, %v3701_v10  ;;  %v1408_v25 = vadd.f32 %v3512_v9, %v1370_v56  ;;  %v1034_v63 = vmul.f32 %v3505_v5, %v3730_v57 }
 0x126   : > { %v2499_v20 = vpop.eup %2498  ;;  %v1607_v18 = vand.u32 2147483647, %v1575_v50  ;;  %v1609_v21 = vand.u32 2147483647, %v1577_v52  ;;  %v1438_v29 = vmul.f32 %v1406_v27, %v3701_v10  ;;  %v1066_v38 = vadd.f32 %v3521_v46, %v1032_v43 }
 0x127   : > { %v1704_v24 = vmul.f32 %v2499_v20, %v1327_v1  ;;  %v1165_v26 = vmul.f32 %v1133_v16, %v3710_v39  ;;  %v1197_v36 = vadd.f32 %v3549_v55, %v1163_v13  ;;  %v1440_v51 = vmul.f32 %v1408_v25, %v3710_v39 }
 0x128   : > { %v1639_v40 = vadd.f32 1.0, %v1607_v18  ;;  %v1641_v15 = vadd.f32 1.0, %v1609_v21  ;;  %v1476_v8 = vadd.f32 %v3538_v28, %v1438_v29  ;;  %v3770_v0 = vadd.f32 %v993_v17, %v3497_v47 }
 0x129   : > { %v946_v12 = vpop.f32.mrf.mxu0  ;;  %v995_v41 = vpop.f32.mrf.mxu1  ;;  %v1732_v59 = vpack.c.bf16 %v1704_v24, %v1702_v42  ;;  %v1199_v60 = vadd.f32 %v3549_v55, %v1165_v26  ;;  %v1229_v61 = vmul.f32 %v1197_v36, %v3701_v10  ;;  %v1326_v1 = vadd.f32 %v3622_v62, %v1292_v2 }
 0x12a   : > { %2500 = vrcp.f32 %v1639_v40  ;;  %v1478_v44 = vadd.f32 %v3538_v28, %v1440_v51  ;;  %v1508_v4 = vmul.f32 %v1476_v8, %v3701_v10  ;;  %v1068_v42 = vadd.f32 %v3521_v46, %v1034_v63 }
 0x12b   : > { %1891 = vmatmul.bf16.gmra.mxu2 %v1732_v59  ;;  %2502 = vrcp.f32 %v1641_v15  ;;  %v1231_v35 = vmul.f32 %v1199_v60, %v3710_v39  ;;  %v1263_v3 = vadd.f32 %v3570_v48, %v1229_v61  ;;  %v1098_v17 = vmul.f32 %v1066_v38, %v3705_v7 }
 0x12c   : > { %v1510_v30 = vmul.f32 %v1478_v44, %v3710_v39  ;;  %v1369_v2 = vmul.f32 %v3507_v6, %v3705_v7  ;;  %v1546_v56 = vadd.f32 %v3553_v53, %v1508_v4  ;;  %v1371_v16 = vmul.f32 %v3507_v6, %v3730_v57 }
 0x12d   : > { %v1265_v50 = vadd.f32 %v3570_v48, %v1231_v35  ;;  %v1295_v52 = vmul.f32 %v1263_v3, %v3701_v10  ;;  %v1100_v27 = vmul.f32 %v1068_v42, %v3730_v57  ;;  %v1132_v43 = vadd.f32 %v3542_v31, %v1098_v17 }
 0x12e   : > { %v1548_v13 = vadd.f32 %v3553_v53, %v1510_v30  ;;  %v1407_v20 = vadd.f32 %v3523_v14, %v1369_v2  ;;  %v3792_v18 = vadd.f32 %v946_v12, %v3495_v22  ;;  %v1328_v21 = vadd.f32 %v3622_v62, %v1294_v32 }
 0x12f   : > { %v1578_v25 = vmul.f32 %v1546_v56, %v3701_v10  ;;  %v1409_v63 = vadd.f32 %v3523_v14, %v1371_v16  ;;  %v1134_v36 = vadd.f32 %v3542_v31, %v1100_v27  ;;  %v1164_v29 = vmul.f32 %v1132_v43, %v3705_v7 }
 0x130   : > { %v2501_v24 = vpop.eup %2500  ;;  %v1580_v26 = vmul.f32 %v1548_v13, %v3710_v39  ;;  %v1439_v40 = vmul.f32 %v1407_v20, %v3705_v7  ;;  %v3802_v51 = vadd.f32 %v995_v41, %v3497_v47  ;;  %v1297_v32 = vmul.f32 %v1265_v50, %v3710_v39 }
 0x131   : > { %v2503_v15 = vpop.eup %2502  ;;  %v949_v38 = vpop.f32.mrf.mxu0  ;;  %v1610_v10 = vand.u32 2147483647, %v1578_v25  ;;  %v1441_v59 = vmul.f32 %v1409_v63, %v3730_v57  ;;  %v1703_v60 = vmul.f32 %v2501_v24, %v1326_v1  ;;  %v1329_v8 = vadd.f32 %v3611_v49, %v1295_v52 }
 0x132   : > { %v998_v12 = vpop.f32.mrf.mxu1  ;;  %v1705_v61 = vmul.f32 %v2503_v15, %v1328_v21  ;;  %v1612_v44 = vand.u32 2147483647, %v1580_v26  ;;  %v1166_v3 = vmul.f32 %v1134_v36, %v3730_v57  ;;  %v1198_v4 = vadd.f32 %v3556_v54, %v1164_v29 }
 0x133   : > { %v1642_v35 = vadd.f32 1.0, %v1610_v10  ;;  %v1477_v41 = vadd.f32 %v3545_v37, %v1439_v40  ;;  %v1479_v17 = vadd.f32 %v3545_v37, %v1441_v59  ;;  %v1035_v39 = vmul.f32 %v3500_v23, %v3744_v45 }
 0x134   : > { %v1733_v30 = vpack.c.bf16 %v1705_v61, %v1703_v60  ;;  %v1644_v42 = vadd.f32 1.0, %v1612_v44  ;;  %v1200_v1 = vadd.f32 %v3556_v54, %v1166_v3  ;;  %v1230_v2 = vmul.f32 %v1198_v4, %v3705_v7 }
 0x135   : > { %2504 = vrcp.f32 %v1642_v35  ;;  %v1509_v50 = vmul.f32 %v1477_v41, %v3705_v7  ;;  %v1511_v52 = vmul.f32 %v1479_v17, %v3730_v57  ;;  %v1037_v56 = vmul.f32 %v3500_v23, %v3792_v18 }
 0x136   : > { %1940 = vmatmul.bf16.gmra.mxu3 %v1733_v30  ;;  %2506 = vrcp.f32 %v1644_v42  ;;  %v1069_v16 = vadd.f32 %v3510_v34, %v1035_v39  ;;  %v1232_v13 = vmul.f32 %v1200_v1, %v3730_v57  ;;  %v1264_v27 = vadd.f32 %v3574_v11, %v1230_v2 }
 0x137   : > { %v1547_v43 = vadd.f32 %v3559_v58, %v1509_v50  ;;  %v1372_v20 = vmul.f32 %v3502_v33, %v3744_v45  ;;  %v1549_v21 = vadd.f32 %v3559_v58, %v1511_v52  ;;  %v1071_v25 = vadd.f32 %v3510_v34, %v1037_v56 }
 0x138   : > { %v1101_v63 = vmul.f32 %v1069_v16, %v3744_v45  ;;  %v1374_v24 = vmul.f32 %v3502_v33, %v3792_v18  ;;  %v3831_v26 = vadd.f32 %v949_v38, %v3495_v22  ;;  %v1331_v40 = vadd.f32 %v3611_v49, %v1297_v32 }
 0x139   : > { %v951_v36 = vpop.f32.mrf.mxu0  ;;  %v1266_v15 = vadd.f32 %v3574_v11, %v1232_v13  ;;  %v1579_v10 = vmul.f32 %v1547_v43, %v3705_v7  ;;  %v3837_v59 = vadd.f32 %v998_v12, %v3497_v47  ;;  %v1581_v60 = vmul.f32 %v1549_v21, %v3730_v57 }
 0x13a   : > { %v1000_v29 = vpop.f32.mrf.mxu1  ;;  %v1103_v61 = vmul.f32 %v1071_v25, %v3792_v18  ;;  %v1410_v44 = vadd.f32 %v3512_v9, %v1372_v20  ;;  %v3843_v38 = vadd.f32 %v951_v36, %v3495_v22  ;;  %v1296_v3 = vmul.f32 %v1264_v27, %v3705_v7 }
 0x13b   : > { %v2505_v35 = vpop.eup %2504  ;;  %v1611_v32 = vand.u32 2147483647, %v1579_v10  ;;  %v1135_v4 = vadd.f32 %v3534_v19, %v1101_v63  ;;  %v1298_v30 = vmul.f32 %v1266_v15, %v3730_v57  ;;  %v1613_v12 = vand.u32 2147483647, %v1581_v60 }
 0x13c   : > { %v2507_v41 = vpop.eup %2506  ;;  %v1137_v42 = vadd.f32 %v3534_v19, %v1103_v61  ;;  %v1412_v17 = vadd.f32 %v3512_v9, %v1374_v24  ;;  %v1706_v39 = vmul.f32 %v2505_v35, %v1329_v8  ;;  %v1442_v7 = vmul.f32 %v1410_v44, %v3744_v45 }
 0x13d   : > { %v1708_v1 = vmul.f32 %v2507_v41, %v1331_v40  ;;  %v1643_v2 = vadd.f32 1.0, %v1611_v32  ;;  %v1167_v50 = vmul.f32 %v1135_v4, %v3744_v45  ;;  %v1645_v52 = vadd.f32 1.0, %v1613_v12 }
 0x13e   : > { %v1169_v56 = vmul.f32 %v1137_v42, %v3792_v18  ;;  %v1444_v16 = vmul.f32 %v1412_v17, %v3792_v18  ;;  %v1036_v27 = vmul.f32 %v3505_v5, %v3770_v0  ;;  %v1480_v43 = vadd.f32 %v3538_v28, %v1442_v7 }
 0x13f   : > { %v1734_v13 = vpack.c.bf16 %v1708_v1, %v1706_v39  ;;  %2508 = vrcp.f32 %v1643_v2  ;;  %v1201_v57 = vadd.f32 %v3549_v55, %v1167_v50  ;;  %v1038_v24 = vmul.f32 %v3505_v5, %v3802_v51 }
 0x140   : > { %2510 = vrcp.f32 %v1645_v52  ;;  %v1203_v8 = vadd.f32 %v3549_v55, %v1169_v56  ;;  %v1482_v20 = vadd.f32 %v3538_v28, %v1444_v16  ;;  %v1070_v36 = vadd.f32 %v3521_v46, %v1036_v27 }
 0x141   : > { %1896 = vmatmul.bf16.gmra.mxu2 %v1734_v13  ;;  %v954_v21 = vpop.f32.mrf.mxu0  ;;  %v1233_v63 = vmul.f32 %v1201_v57, %v3744_v45  ;;  %v1373_v40 = vmul.f32 %v3507_v6, %v3770_v0  ;;  %v3867_v15 = vadd.f32 %v1000_v29, %v3497_v47  ;;  %v1330_v10 = vadd.f32 %v3622_v62, %v1296_v3 }
 0x142   : > { %v1003_v25 = vpop.f32.mrf.mxu1  ;;  %v1235_v60 = vmul.f32 %v1203_v8, %v3792_v18  ;;  %v1512_v61 = vmul.f32 %v1480_v43, %v3744_v45  ;;  %v1514_v35 = vmul.f32 %v1482_v20, %v3792_v18  ;;  %v1072_v32 = vadd.f32 %v3521_v46, %v1038_v24 }
 0x143   : > { %v1267_v44 = vadd.f32 %v3570_v48, %v1233_v63  ;;  %v1102_v4 = vmul.f32 %v1070_v36, %v3770_v0  ;;  %v1332_v41 = vadd.f32 %v3622_v62, %v1298_v30  ;;  %v1375_v29 = vmul.f32 %v3507_v6, %v3802_v51 }
 0x144   : > { %v1550_v12 = vadd.f32 %v3553_v53, %v1512_v61  ;;  %v1411_v3 = vadd.f32 %v3523_v14, %v1373_v40  ;;  %v3882_v17 = vadd.f32 %v954_v21, %v3495_v22  ;;  %v1552_v39 = vadd.f32 %v3553_v53, %v1514_v35 }
 0x145   : > { %v2509_v42 = vpop.eup %2508  ;;  %v1104_v1 = vmul.f32 %v1072_v32, %v3802_v51  ;;  %v1136_v2 = vadd.f32 %v3542_v31, %v1102_v4  ;;  %v1269_v30 = vadd.f32 %v3570_v48, %v1235_v60  ;;  %v1299_v52 = vmul.f32 %v1267_v44, %v3744_v45 }
 0x146   : > { %v2511_v50 = vpop.eup %2510  ;;  %v1582_v56 = vmul.f32 %v1550_v12, %v3744_v45  ;;  %v1413_v7 = vadd.f32 %v3523_v14, %v1375_v29  ;;  %v1707_v16 = vmul.f32 %v2509_v42, %v1330_v10  ;;  %v1584_v57 = vmul.f32 %v1552_v39, %v3792_v18 }
 0x147   : > { %v1709_v13 = vmul.f32 %v2511_v50, %v1332_v41  ;;  %v1138_v27 = vadd.f32 %v3542_v31, %v1104_v1  ;;  %v3894_v8 = vadd.f32 %v1003_v25, %v3497_v47  ;;  %v1168_v20 = vmul.f32 %v1136_v2, %v3770_v0 }
 0x148   : > { %v1614_v43 = vand.u32 2147483647, %v1582_v56  ;;  %v1443_v21 = vmul.f32 %v1411_v3, %v3770_v0  ;;  %v1616_v45 = vand.u32 2147483647, %v1584_v57  ;;  %v1445_v10 = vmul.f32 %v1413_v7, %v3802_v51 }
 0x149   : > { %v1735_v63 = vpack.c.bf16 %v1709_v13, %v1707_v16  ;;  %v956_v24 = vpop.f32.mrf.mxu0  ;;  %v1170_v40 = vmul.f32 %v1138_v27, %v3802_v51  ;;  %v1301_v60 = vmul.f32 %v1269_v30, %v3792_v18  ;;  %v1333_v61 = vadd.f32 %v3611_v49, %v1299_v52 }
 0x14a   : > { %v1005_v36 = vpop.f32.mrf.mxu1  ;;  %v1646_v44 = vadd.f32 1.0, %v1614_v43  ;;  %v1202_v25 = vadd.f32 %v3556_v54, %v1168_v20  ;;  %v1648_v35 = vadd.f32 1.0, %v1616_v45  ;;  %v1481_v4 = vadd.f32 %v3545_v37, %v1443_v21 }
 0x14b   : > { %1945 = vmatmul.bf16.gmra.mxu3 %v1735_v63  ;;  %v1204_v32 = vadd.f32 %v3556_v54, %v1170_v40  ;;  %v1483_v41 = vadd.f32 %v3545_v37, %v1445_v10  ;;  %v1039_v29 = vmul.f32 %v3500_v23, %v3831_v26  ;;  %v1041_v18 = vmul.f32 %v3500_v23, %v3843_v38 }
 0x14c   : > { %2512 = vrcp.f32 %v1646_v44  ;;  %v1234_v12 = vmul.f32 %v1202_v25, %v3770_v0  ;;  %v1513_v42 = vmul.f32 %v1481_v4, %v3770_v0  ;;  %v1376_v30 = vmul.f32 %v3502_v33, %v3831_v26 }
 0x14d   : > { %2514 = vrcp.f32 %v1648_v35  ;;  %v1236_v3 = vmul.f32 %v1204_v32, %v3802_v51  ;;  %v1515_v39 = vmul.f32 %v1483_v41, %v3802_v51  ;;  %v1073_v2 = vadd.f32 %v3510_v34, %v1039_v29 }
 0x14e   : > { %v1268_v1 = vadd.f32 %v3574_v11, %v1234_v12  ;;  %v1075_v50 = vadd.f32 %v3510_v34, %v1041_v18  ;;  %v1551_v56 = vadd.f32 %v3559_v58, %v1513_v42  ;;  %v1378_v16 = vmul.f32 %v3502_v33, %v3843_v38 }
 0x14f   : > { %v1270_v52 = vadd.f32 %v3574_v11, %v1236_v3  ;;  %v1553_v7 = vadd.f32 %v3559_v58, %v1515_v39  ;;  %v1105_v57 = vmul.f32 %v1073_v2, %v3831_v26  ;;  %v1414_v43 = vadd.f32 %v3512_v9, %v1376_v30 }
 0x150   : > { %v1300_v13 = vmul.f32 %v1268_v1, %v3770_v0  ;;  %v1107_v27 = vmul.f32 %v1075_v50, %v3843_v38  ;;  %v1335_v20 = vadd.f32 %v3611_v49, %v1301_v60  ;;  %v1583_v21 = vmul.f32 %v1551_v56, %v3770_v0 }
 0x151   : > { %v1585_v63 = vmul.f32 %v1553_v7, %v3802_v51  ;;  %v959_v45 = vpop.f32.mrf.mxu0  ;;  %v1416_v40 = vadd.f32 %v3512_v9, %v1378_v16  ;;  %v3933_v44 = vadd.f32 %v956_v24, %v3495_v22  ;;  %v3936_v25 = vadd.f32 %v1005_v36, %v3497_v47 }
 0x152   : > { %v2513_v10 = vpop.eup %2512  ;;  %v1302_v35 = vmul.f32 %v1270_v52, %v3802_v51  ;;  %v1139_v32 = vadd.f32 %v3534_v19, %v1105_v57  ;;  %v1334_v0 = vadd.f32 %v3622_v62, %v1300_v13  ;;  %v1615_v41 = vand.u32 2147483647, %v1583_v21  ;;  %v1008_v29 = vpop.f32.mrf.mxu1 }
 0x153   : > { %v2515_v4 = vpop.eup %2514  ;;  %v1710_v60 = vmul.f32 %v2513_v10, %v1333_v61  ;;  %v1617_v12 = vand.u32 2147483647, %v1585_v63  ;;  %v1141_v3 = vadd.f32 %v3534_v19, %v1107_v27  ;;  %v1446_v42 = vmul.f32 %v1414_v43, %v3831_v26 }
 0x154   : > { %v1712_v18 = vmul.f32 %v2515_v4, %v1335_v20  ;;  %v1171_v24 = vmul.f32 %v1139_v32, %v3831_v26  ;;  %v1647_v36 = vadd.f32 1.0, %v1615_v41  ;;  %v1448_v51 = vmul.f32 %v1416_v40, %v3843_v38 }
 0x155   : > { %v1649_v39 = vadd.f32 1.0, %v1617_v12  ;;  %v1040_v1 = vmul.f32 %v3505_v5, %v3837_v59  ;;  %v1173_v2 = vmul.f32 %v1141_v3, %v3843_v38  ;;  %v1484_v30 = vadd.f32 %v3538_v28, %v1446_v42 }
 0x156   : > { %v1736_v61 = vpack.c.bf16 %v1712_v18, %v1710_v60  ;;  %v1205_v50 = vadd.f32 %v3549_v55, %v1171_v24  ;;  %2516 = vrcp.f32 %v1647_v36  ;;  %v1486_v52 = vadd.f32 %v3538_v28, %v1448_v51 }
 0x157   : > { %v1042_v56 = vmul.f32 %v3505_v5, %v3867_v15  ;;  %v1074_v7 = vadd.f32 %v3521_v46, %v1040_v1  ;;  %2518 = vrcp.f32 %v1649_v39  ;;  %v1207_v16 = vadd.f32 %v3549_v55, %v1173_v2 }
 0x158   : > { %1901 = vmatmul.bf16.gmra.mxu2 %v1736_v61  ;;  %v1237_v13 = vmul.f32 %v1205_v50, %v3831_v26  ;;  %v1516_v57 = vmul.f32 %v1484_v30, %v3831_v26  ;;  %v1518_v43 = vmul.f32 %v1486_v52, %v3843_v38  ;;  %v1377_v63 = vmul.f32 %v3507_v6, %v3837_v59 }
 0x159   : > { %v961_v27 = vpop.f32.mrf.mxu0  ;;  %v1076_v20 = vadd.f32 %v3521_v46, %v1042_v56  ;;  %v1106_v21 = vmul.f32 %v1074_v7, %v3837_v59  ;;  %v3963_v40 = vadd.f32 %v959_v45, %v3495_v22  ;;  %v3966_v10 = vadd.f32 %v1008_v29, %v3497_v47 }
 0x15a   : > { %v1239_v32 = vmul.f32 %v1207_v16, %v3843_v38  ;;  %v1271_v4 = vadd.f32 %v3570_v48, %v1237_v13  ;;  %v1554_v60 = vadd.f32 %v3553_v53, %v1516_v57  ;;  %v1556_v41 = vadd.f32 %v3553_v53, %v1518_v43  ;;  %v1010_v36 = vpop.f32.mrf.mxu1 }
 0x15b   : > { %v1108_v12 = vmul.f32 %v1076_v20, %v3867_v15  ;;  %v1140_v18 = vadd.f32 %v3542_v31, %v1106_v21  ;;  %v1336_v3 = vadd.f32 %v3622_v62, %v1302_v35  ;;  %v3976_v45 = vadd.f32 %v961_v27, %v3495_v22 }
 0x15c   : > { %v1379_v29 = vmul.f32 %v3507_v6, %v3867_v15  ;;  %v1415_v24 = vadd.f32 %v3523_v14, %v1377_v63  ;;  %v2517_v42 = vpop.eup %2516  ;;  %v1586_v39 = vmul.f32 %v1554_v60, %v3831_v26  ;;  %v1588_v51 = vmul.f32 %v1556_v41, %v3843_v38 }
 0x15d   : > { %v1142_v1 = vadd.f32 %v3542_v31, %v1108_v12  ;;  %v1172_v61 = vmul.f32 %v1140_v18, %v3837_v59  ;;  %v2519_v2 = vpop.eup %2518  ;;  %v1711_v35 = vmul.f32 %v2517_v42, %v1334_v0  ;;  %v1273_v50 = vadd.f32 %v3570_v48, %v1239_v32 }
 0x15e   : > { %v1303_v30 = vmul.f32 %v1271_v4, %v3831_v26  ;;  %v1417_v52 = vadd.f32 %v3523_v14, %v1379_v29  ;;  %v1713_v56 = vmul.f32 %v2519_v2, %v1336_v3  ;;  %v1618_v7 = vand.u32 2147483647, %v1586_v39 }
 0x15f   : > { %v1620_v16 = vand.u32 2147483647, %v1588_v51  ;;  %v1174_v13 = vmul.f32 %v1142_v1, %v3867_v15  ;;  %v3990_v57 = vadd.f32 %v1010_v36, %v3497_v47  ;;  %v1206_v27 = vadd.f32 %v3556_v54, %v1172_v61 }
 0x160   : > { %v1447_v43 = vmul.f32 %v1415_v24, %v3837_v59  ;;  %v1449_v0 = vmul.f32 %v1417_v52, %v3867_v15  ;;  %v1737_v20 = vpack.c.bf16 %v1713_v56, %v1711_v35  ;;  %v1650_v21 = vadd.f32 1.0, %v1618_v7 }
 0x161   : > { %v1652_v63 = vadd.f32 1.0, %v1620_v16  ;;  %v1208_v26 = vadd.f32 %v3556_v54, %v1174_v13  ;;  %v1305_v32 = vmul.f32 %v1273_v50, %v3843_v38  ;;  %v1238_v4 = vmul.f32 %v1206_v27, %v3837_v59  ;;  %v964_v35 = vpop.f32.mrf.mxu0 }
 0x162   : > { %v1485_v60 = vadd.f32 %v3545_v37, %v1447_v43  ;;  %v1487_v41 = vadd.f32 %v3545_v37, %v1449_v0  ;;  %1950 = vmatmul.bf16.gmra.mxu3 %v1737_v20  ;;  %v1337_v12 = vadd.f32 %v3611_v49, %v1303_v30  ;;  %2520 = vrcp.f32 %v1650_v21 }
 0x163   : > { %v1240_v18 = vmul.f32 %v1208_v26, %v3867_v15  ;;  %v1043_v3 = vmul.f32 %v3500_v23, %v3882_v17  ;;  %2522 = vrcp.f32 %v1652_v63  ;;  %v1272_v29 = vadd.f32 %v3574_v11, %v1238_v4 }
 0x164   : > { %v1517_v38 = vmul.f32 %v1485_v60, %v3837_v59  ;;  %v1519_v24 = vmul.f32 %v1487_v41, %v3867_v15  ;;  %v1045_v36 = vmul.f32 %v3500_v23, %v3933_v44  ;;  %v1380_v51 = vmul.f32 %v3502_v33, %v3882_v17 }
 0x165   : > { %v1274_v42 = vadd.f32 %v3574_v11, %v1240_v18  ;;  %v1077_v39 = vadd.f32 %v3510_v34, %v1043_v3  ;;  %v1304_v1 = vmul.f32 %v1272_v29, %v3837_v59  ;;  %v1382_v50 = vmul.f32 %v3502_v33, %v3933_v44 }
 0x166   : > { %v1555_v61 = vadd.f32 %v3559_v58, %v1517_v38  ;;  %v1557_v2 = vadd.f32 %v3559_v58, %v1519_v24  ;;  %v1079_v52 = vadd.f32 %v3510_v34, %v1045_v36  ;;  %v1418_v7 = vadd.f32 %v3512_v9, %v1380_v51 }
 0x167   : > { %v1306_v30 = vmul.f32 %v1274_v42, %v3867_v15  ;;  %v1109_v56 = vmul.f32 %v1077_v39, %v3882_v17  ;;  %v1339_v16 = vadd.f32 %v3611_v49, %v1305_v32  ;;  %v1420_v43 = vadd.f32 %v3512_v9, %v1382_v50 }
 0x168   : > { %v1587_v13 = vmul.f32 %v1555_v61, %v3837_v59  ;;  %v1589_v27 = vmul.f32 %v1557_v2, %v3867_v15  ;;  %v2521_v0 = vpop.eup %2520  ;;  %v4027_v20 = vadd.f32 %v964_v35, %v3495_v22  ;;  %v1111_v21 = vmul.f32 %v1079_v52, %v3933_v44 }
 0x169   : > { %v1143_v63 = vadd.f32 %v3534_v19, %v1109_v56  ;;  %v1450_v26 = vmul.f32 %v1418_v7, %v3882_v17  ;;  %v2523_v4 = vpop.eup %2522  ;;  %v1338_v60 = vadd.f32 %v3622_v62, %v1304_v1  ;;  %v1340_v32 = vadd.f32 %v3622_v62, %v1306_v30 }
 0x16a   : > { %v1619_v59 = vand.u32 2147483647, %v1587_v13  ;;  %v1621_v41 = vand.u32 2147483647, %v1589_v27  ;;  %v1714_v15 = vmul.f32 %v2521_v0, %v1337_v12  ;;  %v1716_v18 = vmul.f32 %v2523_v4, %v1339_v16 }
 0x16b   : > { %v1145_v3 = vadd.f32 %v3534_v19, %v1111_v21  ;;  %v1175_v29 = vmul.f32 %v1143_v63, %v3882_v17  ;;  %v1452_v42 = vmul.f32 %v1420_v43, %v3933_v44  ;;  %v1488_v36 = vadd.f32 %v3538_v28, %v1450_v26  ;;  %v1013_v63 = vpop.f32.mrf.mxu1 }
 0x16c   : > { %v1651_v38 = vadd.f32 1.0, %v1619_v59  ;;  %v1653_v24 = vadd.f32 1.0, %v1621_v41  ;;  %v1738_v39 = vpack.c.bf16 %v1716_v18, %v1714_v15  ;;  %v1044_v61 = vmul.f32 %v3505_v5, %v3894_v8 }
 0x16d   : > { %v1177_v51 = vmul.f32 %v1145_v3, %v3933_v44  ;;  %v1209_v1 = vadd.f32 %v3549_v55, %v1175_v29  ;;  %v1490_v12 = vadd.f32 %v3538_v28, %v1452_v42  ;;  %v1520_v2 = vmul.f32 %v1488_v36, %v3882_v17 }
 0x16e   : > { %2524 = vrcp.f32 %v1651_v38  ;;  %v1046_v35 = vmul.f32 %v3505_v5, %v3936_v25  ;;  %1906 = vmatmul.bf16.gmra.mxu2 %v1738_v39  ;;  %v1078_v52 = vadd.f32 %v3521_v46, %v1044_v61  ;;  %v1381_v13 = vmul.f32 %v3507_v6, %v3894_v8 }
 0x16f   : > { %2526 = vrcp.f32 %v1653_v24  ;;  %v1211_v50 = vadd.f32 %v3549_v55, %v1177_v51  ;;  %v1241_v30 = vmul.f32 %v1209_v1, %v3882_v17  ;;  %v1522_v56 = vmul.f32 %v1490_v12, %v3933_v44 }
 0x170   : > { %v1558_v7 = vadd.f32 %v3553_v53, %v1520_v2  ;;  %v1080_v16 = vadd.f32 %v3521_v46, %v1046_v35  ;;  %v1110_v0 = vmul.f32 %v1078_v52, %v3894_v8  ;;  %v1383_v21 = vmul.f32 %v3507_v6, %v3936_v25 }
 0x171   : > { %v1243_v27 = vmul.f32 %v1211_v50, %v3933_v44  ;;  %v1275_v43 = vadd.f32 %v3570_v48, %v1241_v30  ;;  %v1560_v26 = vadd.f32 %v3553_v53, %v1522_v56  ;;  %v1419_v41 = vadd.f32 %v3523_v14, %v1381_v13 }
 0x172   : > { %v1590_v4 = vmul.f32 %v1558_v7, %v3882_v17  ;;  %v1112_v59 = vmul.f32 %v1080_v16, %v3936_v25  ;;  %v1144_v3 = vadd.f32 %v3542_v31, %v1110_v0  ;;  %v1421_v29 = vadd.f32 %v3523_v14, %v1383_v21 }
 0x173   : > { %v1277_v15 = vadd.f32 %v3570_v48, %v1243_v27  ;;  %v1307_v18 = vmul.f32 %v1275_v43, %v3882_v17  ;;  %v1592_v24 = vmul.f32 %v1560_v26, %v3933_v44  ;;  %v1451_v39 = vmul.f32 %v1419_v41, %v3894_v8 }
 0x174   : > { %v2525_v38 = vpop.eup %2524  ;;  %v1622_v42 = vand.u32 2147483647, %v1590_v4  ;;  %v1146_v36 = vadd.f32 %v3542_v31, %v1112_v59  ;;  %v4071_v61 = vadd.f32 %v1013_v63, %v3497_v47  ;;  %v1176_v17 = vmul.f32 %v1144_v3, %v3894_v8 }
 0x175   : > { %v2527_v51 = vpop.eup %2526  ;;  %v1715_v1 = vmul.f32 %v2525_v38, %v1338_v60  ;;  %v1309_v12 = vmul.f32 %v1277_v15, %v3933_v44  ;;  %v1624_v35 = vand.u32 2147483647, %v1592_v24  ;;  %v1341_v52 = vadd.f32 %v3611_v49, %v1307_v18 }
 0x176   : > { %v1717_v2 = vmul.f32 %v2527_v51, %v1340_v32  ;;  %v1654_v50 = vadd.f32 1.0, %v1622_v42  ;;  %v1178_v30 = vmul.f32 %v1146_v36, %v3936_v25  ;;  %v1210_v56 = vadd.f32 %v3556_v54, %v1176_v17 }
 0x177   : > { %v1453_v7 = vmul.f32 %v1421_v29, %v3936_v25  ;;  %v1489_v60 = vadd.f32 %v3545_v37, %v1451_v39  ;;  %v1656_v13 = vadd.f32 1.0, %v1624_v35  ;;  %v1047_v0 = vmul.f32 %v3500_v23, %v3963_v40 }
 0x178   : > { %v1739_v16 = vpack.c.bf16 %v1717_v2, %v1715_v1  ;;  %2528 = vrcp.f32 %v1654_v50  ;;  %v1212_v44 = vadd.f32 %v3556_v54, %v1178_v30  ;;  %v1242_v27 = vmul.f32 %v1210_v56, %v3894_v8 }
 0x179   : > { %v1491_v32 = vadd.f32 %v3545_v37, %v1453_v7  ;;  %v1521_v43 = vmul.f32 %v1489_v60, %v3894_v8  ;;  %2530 = vrcp.f32 %v1656_v13  ;;  %v1049_v63 = vmul.f32 %v3500_v23, %v3976_v45 }
 0x17a   : > { %1955 = vmatmul.bf16.gmra.mxu3 %v1739_v16  ;;  %v1244_v21 = vmul.f32 %v1212_v44, %v3936_v25  ;;  %v1384_v26 = vmul.f32 %v3502_v33, %v3963_v40  ;;  %v1276_v4 = vadd.f32 %v3574_v11, %v1242_v27  ;;  %v1081_v15 = vadd.f32 %v3510_v34, %v1047_v0 }
 0x17b   : > { %v1523_v59 = vmul.f32 %v1491_v32, %v3936_v25  ;;  %v1559_v41 = vadd.f32 %v3559_v58, %v1521_v43  ;;  %v1083_v3 = vadd.f32 %v3510_v34, %v1049_v63  ;;  %v1386_v29 = vmul.f32 %v3502_v33, %v3976_v45 }
 0x17c   : > { %v1278_v18 = vadd.f32 %v3574_v11, %v1244_v21  ;;  %v1422_v38 = vadd.f32 %v3512_v9, %v1384_v26  ;;  %v1308_v24 = vmul.f32 %v1276_v4, %v3894_v8  ;;  %v1113_v39 = vmul.f32 %v1081_v15, %v3963_v40 }
 0x17d   : > { %v1561_v42 = vadd.f32 %v3559_v58, %v1523_v59  ;;  %v1591_v36 = vmul.f32 %v1559_v41, %v3894_v8  ;;  %v1343_v1 = vadd.f32 %v3611_v49, %v1309_v12  ;;  %v1115_v17 = vmul.f32 %v1083_v3, %v3976_v45 }
 0x17e   : > { %v2529_v51 = vpop.eup %2528  ;;  %v1424_v2 = vadd.f32 %v3512_v9, %v1386_v29  ;;  %v1454_v35 = vmul.f32 %v1422_v38, %v3963_v40  ;;  %v1310_v30 = vmul.f32 %v1278_v18, %v3936_v25  ;;  %v1342_v8 = vadd.f32 %v3622_v62, %v1308_v24 }
 0x17f   : > { %v1718_v50 = vmul.f32 %v2529_v51, %v1341_v52  ;;  %v1593_v56 = vmul.f32 %v1561_v42, %v3936_v25  ;;  %v1623_v7 = vand.u32 2147483647, %v1591_v36  ;;  %v2531_v60 = vpop.eup %2530  ;;  %v1147_v16 = vadd.f32 %v3534_v19, %v1113_v39  ;;  %v966_v51 = vpop.f32.mrf.mxu0 }
 0x180   : > { %v1149_v13 = vadd.f32 %v3534_v19, %v1115_v17  ;;  %v1456_v12 = vmul.f32 %v1424_v2, %v3976_v45  ;;  %v1720_v44 = vmul.f32 %v2531_v60, %v1343_v1  ;;  %v1492_v43 = vadd.f32 %v3538_v28, %v1454_v35 }
 0x181   : > { %v1625_v27 = vand.u32 2147483647, %v1593_v56  ;;  %v1655_v32 = vadd.f32 1.0, %v1623_v7  ;;  %v1179_v52 = vmul.f32 %v1147_v16, %v3963_v40  ;;  %v1048_v21 = vmul.f32 %v3505_v5, %v3966_v10 }
 0x182   : > { %v1181_v0 = vmul.f32 %v1149_v13, %v3976_v45  ;;  %v1494_v25 = vadd.f32 %v3538_v28, %v1456_v12  ;;  %v1740_v63 = vpack.c.bf16 %v1720_v44, %v1718_v50  ;;  %v1524_v4 = vmul.f32 %v1492_v43, %v3963_v40 }
 0x183   : > { %v1657_v26 = vadd.f32 1.0, %v1625_v27  ;;  %2532 = vrcp.f32 %v1655_v32  ;;  %v1213_v59 = vadd.f32 %v3549_v55, %v1179_v52  ;;  %v1050_v18 = vmul.f32 %v3505_v5, %v3990_v57 }
 0x184   : > { %v1215_v41 = vadd.f32 %v3549_v55, %v1181_v0  ;;  %v1526_v15 = vmul.f32 %v1494_v25, %v3976_v45  ;;  %1911 = vmatmul.bf16.gmra.mxu2 %v1740_v63  ;;  %v1562_v3 = vadd.f32 %v3553_v53, %v1524_v4  ;;  %v1082_v29 = vadd.f32 %v3521_v46, %v1048_v21 }
 0x185   : > { %2534 = vrcp.f32 %v1657_v26  ;;  %v1385_v38 = vmul.f32 %v3507_v6, %v3966_v10  ;;  %v1245_v24 = vmul.f32 %v1213_v59, %v3963_v40  ;;  %v1084_v39 = vadd.f32 %v3521_v46, %v1050_v18 }
 0x186   : > { %v1247_v42 = vmul.f32 %v1215_v41, %v3976_v45  ;;  %v1564_v36 = vadd.f32 %v3553_v53, %v1526_v15  ;;  %v1594_v1 = vmul.f32 %v1562_v3, %v3963_v40  ;;  %v1114_v17 = vmul.f32 %v1082_v29, %v3966_v10 }
 0x187   : > { %v1387_v2 = vmul.f32 %v3507_v6, %v3990_v57  ;;  %v1423_v35 = vadd.f32 %v3523_v14, %v1385_v38  ;;  %v1279_v50 = vadd.f32 %v3570_v48, %v1245_v24  ;;  %v1116_v60 = vmul.f32 %v1084_v39, %v3990_v57 }
 0x188   : > { %v1281_v56 = vadd.f32 %v3570_v48, %v1247_v42  ;;  %v1596_v7 = vmul.f32 %v1564_v36, %v3976_v45  ;;  %v1626_v13 = vand.u32 2147483647, %v1594_v1  ;;  %v1148_v12 = vadd.f32 %v3542_v31, %v1114_v17  ;;  %v1015_v17 = vpop.f32.mrf.mxu1 }
 0x189   : > { %v2533_v16 = vpop.eup %2532  ;;  %v1425_v44 = vadd.f32 %v3523_v14, %v1387_v2  ;;  %v1455_v27 = vmul.f32 %v1423_v35, %v3966_v10  ;;  %v4147_v32 = vadd.f32 %v966_v51, %v3495_v22  ;;  %v1344_v43 = vadd.f32 %v3622_v62, %v1310_v30 }
 0x18a   : > { %v1719_v52 = vmul.f32 %v2533_v16, %v1342_v8  ;;  %v1628_v0 = vand.u32 2147483647, %v1596_v7  ;;  %v1658_v21 = vadd.f32 1.0, %v1626_v13  ;;  %v1150_v63 = vadd.f32 %v3542_v31, %v1116_v60 }
 0x18b   : > { %v2535_v25 = vpop.eup %2534  ;;  %v1180_v26 = vmul.f32 %v1148_v12, %v3966_v10  ;;  %v1457_v4 = vmul.f32 %v1425_v44, %v3990_v57  ;;  %v1311_v41 = vmul.f32 %v1279_v50, %v3963_v40  ;;  %v1313_v15 = vmul.f32 %v1281_v56, %v3976_v45 }
 0x18c   : > { %v1721_v59 = vmul.f32 %v2535_v25, %v1344_v43  ;;  %v1660_v18 = vadd.f32 1.0, %v1628_v0  ;;  %2536 = vrcp.f32 %v1658_v21  ;;  %v1182_v22 = vmul.f32 %v1150_v63, %v3990_v57 }
 0x18d   : > { %v1214_v30 = vadd.f32 %v3556_v54, %v1180_v26  ;;  %v1493_v8 = vadd.f32 %v3545_v37, %v1455_v27  ;;  %v1495_v29 = vadd.f32 %v3545_v37, %v1457_v4  ;;  %v1051_v38 = vmul.f32 %v3500_v23, %v4027_v20 }
 0x18e   : > { %v1741_v3 = vpack.c.bf16 %v1721_v59, %v1719_v52  ;;  %2538 = vrcp.f32 %v1660_v18  ;;  %v1216_v24 = vadd.f32 %v3556_v54, %v1182_v22  ;;  %v1053_v42 = vmul.f32 %v3500_v23, %v4147_v32 }
 0x18f   : > { %v1246_v40 = vmul.f32 %v1214_v30, %v3966_v10  ;;  %v1525_v45 = vmul.f32 %v1493_v8, %v3966_v10  ;;  %v1527_v36 = vmul.f32 %v1495_v29, %v3990_v57  ;;  %v1085_v39 = vadd.f32 %v3510_v34, %v1051_v38 }
 0x190   : > { %1960 = vmatmul.bf16.gmra.mxu3 %v1741_v3  ;;  %v1388_v51 = vmul.f32 %v3502_v33, %v4027_v20  ;;  %v1390_v1 = vmul.f32 %v3502_v33, %v4147_v32  ;;  %v1345_v2 = vadd.f32 %v3611_v49, %v1311_v41  ;;  %v1248_v35 = vmul.f32 %v1216_v24, %v3990_v57 }
 0x191   : > { %v1563_v50 = vadd.f32 %v3559_v58, %v1525_v45  ;;  %v1087_v23 = vadd.f32 %v3510_v34, %v1053_v42  ;;  %v1565_v56 = vadd.f32 %v3559_v58, %v1527_v36  ;;  %v1117_v7 = vmul.f32 %v1085_v39, %v4027_v20 }
 0x192   : > { %v1426_v60 = vadd.f32 %v3512_v9, %v1388_v51  ;;  %v1428_v16 = vadd.f32 %v3512_v9, %v1390_v1  ;;  %v2537_v13 = vpop.eup %2536  ;;  %v1347_v33 = vadd.f32 %v3611_v49, %v1313_v15  ;;  %v1280_v12 = vadd.f32 %v3574_v11, %v1246_v40 }
 0x193   : > { %v1595_v44 = vmul.f32 %v1563_v50, %v3966_v10  ;;  %v1119_v27 = vmul.f32 %v1087_v23, %v4147_v32  ;;  %v4185_v34 = vadd.f32 %v1015_v17, %v3497_v47  ;;  %v1597_v52 = vmul.f32 %v1565_v56, %v3990_v57 }
 0x194   : > { %v2539_v43 = vpop.eup %2538  ;;  %v1151_v0 = vadd.f32 %v3534_v19, %v1117_v7  ;;  %v1458_v25 = vmul.f32 %v1426_v60, %v4027_v20  ;;  %v1722_v9 = vmul.f32 %v2537_v13, %v1345_v2  ;;  %v1282_v63 = vadd.f32 %v3574_v11, %v1248_v35 }
 0x195   : > { %v1724_v21 = vmul.f32 %v2539_v43, %v1347_v33  ;;  %v1627_v26 = vand.u32 2147483647, %v1595_v44  ;;  %v1629_v4 = vand.u32 2147483647, %v1597_v52  ;;  %v1153_v59 = vadd.f32 %v3534_v19, %v1119_v27 }
 0x196   : > { %v1183_v41 = vmul.f32 %v1151_v0, %v4027_v20  ;;  %v1460_v15 = vmul.f32 %v1428_v16, %v4147_v32  ;;  %v1312_v18 = vmul.f32 %v1280_v12, %v3966_v10  ;;  %v1496_v30 = vadd.f32 %v3538_v28, %v1458_v25 }
 0x197   : > { %v1742_v47 = vpack.c.bf16 %v1724_v21, %v1722_v9  ;;  %v1659_v22 = vadd.f32 1.0, %v1627_v26  ;;  %v1661_v8 = vadd.f32 1.0, %v1629_v4  ;;  %v1185_v3 = vmul.f32 %v1153_v59, %v4147_v32 }
 0x198   : > { %v1217_v29 = vadd.f32 %v3549_v55, %v1183_v41  ;;  %v1498_v38 = vadd.f32 %v3538_v28, %v1460_v15  ;;  %v1528_v19 = vmul.f32 %v1496_v30, %v4027_v20  ;;  %v1052_v24 = vmul.f32 %v3505_v5, %v4071_v61 }
 0x199   : > { %1916 = vmatmul.bf16.gmra.mxu2 %v1742_v47  ;;  %2540 = vrcp.f32 %v1659_v22  ;;  %v1054_v10 = vmul.f32 %v3505_v5, %v4185_v34  ;;  %v1314_v40 = vmul.f32 %v1282_v63, %v3990_v57  ;;  %v1219_v45 = vadd.f32 %v3549_v55, %v1185_v3 }
 0x19a   : > { %2542 = vrcp.f32 %v1661_v8  ;;  %v1530_v42 = vmul.f32 %v1498_v38, %v4147_v32  ;;  %v1566_v36 = vadd.f32 %v3553_v53, %v1528_v19  ;;  %v1086_v28 = vadd.f32 %v3521_v46, %v1052_v24 }
 0x19b   : > { %v1088_v39 = vadd.f32 %v3521_v46, %v1054_v10  ;;  %v1389_v51 = vmul.f32 %v3507_v6, %v4071_v61  ;;  %v1249_v1 = vmul.f32 %v1217_v29, %v4027_v20  ;;  %v1251_v5 = vmul.f32 %v1219_v45, %v4147_v32 }
 0x19c   : > { %v1568_v57 = vadd.f32 %v3553_v53, %v1530_v42  ;;  %v1391_v55 = vmul.f32 %v3507_v6, %v4185_v34  ;;  %v1598_v17 = vmul.f32 %v1566_v36, %v4027_v20  ;;  %v1118_v2 = vmul.f32 %v1086_v28, %v4071_v61 }
 0x19d   : > { %v1120_v35 = vmul.f32 %v1088_v39, %v4185_v34  ;;  %v1427_v46 = vadd.f32 %v3523_v14, %v1389_v51  ;;  %v1887_v50 = vpop.f32.mrf.mxu2  ;;  %v1346_v23 = vadd.f32 %v3622_v62, %v1312_v18  ;;  %v1348_v56 = vadd.f32 %v3622_v62, %v1314_v40 }
 0x19e   : > { %v1600_v7 = vmul.f32 %v1568_v57, %v4147_v32  ;;  %v1429_v53 = vadd.f32 %v3523_v14, %v1391_v55  ;;  %v1936_v60 = vpop.f32.mrf.mxu3  ;;  %v1630_v6 = vand.u32 2147483647, %v1598_v17  ;;  %v1152_v13 = vadd.f32 %v3542_v31, %v1118_v2  ;;  %v4233_v14 = vld [vmem:[%s4350_s4] ss:$0 sm:$0xff] }
 0x19f   : > { %v2541_v16 = vpop.eup %2540  ;;  %v1154_v33 = vadd.f32 %v3542_v31, %v1120_v35  ;;  %v1459_v12 = vmul.f32 %v1427_v46, %v4071_v61  ;;  %v1283_v43 = vadd.f32 %v3570_v48, %v1249_v1  ;;  %v1285_v52 = vadd.f32 %v3570_v48, %v1251_v5 }
 0x1a0   : > { %v2543_v44 = vpop.eup %2542  ;;  %v1723_v27 = vmul.f32 %v2541_v16, %v1346_v23  ;;  %v1632_v0 = vand.u32 2147483647, %v1600_v7  ;;  %v1662_v9 = vadd.f32 1.0, %v1630_v6  ;;  %v1184_v21 = vmul.f32 %v1152_v13, %v4071_v61 }
 0x1a1   : > { %v1725_v25 = vmul.f32 %v2543_v44, %v1348_v56  ;;  %v1186_v31 = vmul.f32 %v1154_v33, %v4185_v34  ;;  %v1461_v26 = vmul.f32 %v1429_v53, %v4185_v34  ;;  %v1497_v4 = vadd.f32 %v3545_v37, %v1459_v12 }
 0x1a2   : > { %v1664_v63 = vadd.f32 1.0, %v1632_v0  ;;  %2544 = vrcp.f32 %v1662_v9  ;;  %v1888_v15 = vadd.f32 %v4233_v14, %v1887_v50  ;;  %v1315_v47 = vmul.f32 %v1283_v43, %v4027_v20 }
 0x1a3   : > { %v1743_v59 = vpack.c.bf16 %v1725_v25, %v1723_v27  ;;  %v1499_v48 = vadd.f32 %v3545_v37, %v1461_v26  ;;  %v1529_v41 = vmul.f32 %v1497_v4, %v4071_v61  ;;  %v1317_v18 = vmul.f32 %v1285_v52, %v4147_v32  ;;  %v2552_v32 = vld [vmem:[%s3060_s13] sm:$0xff]  ;;  %v2555_v25 = vld [vmem:[%s3060_s13 + $0x18] sm:$0xff] }
 0x1a4   : > { %2546 = vrcp.f32 %v1664_v63  ;;  %v1218_v22 = vadd.f32 %v3556_v54, %v1184_v21  ;;  %v1220_v30 = vadd.f32 %v3556_v54, %v1186_v31  ;;  %v1937_v37 = vadd.f32 %v1936_v60, %v1888_v15 }
 0x1a5   : > { %1965 = vmatmul.bf16.gmra.mxu3 %v1743_v59  ;;  %v1889_v8 = vpop.f32.mrf.mxu2  ;;  %v1531_v3 = vmul.f32 %v1499_v48, %v4185_v34  ;;  %v1567_v29 = vadd.f32 %v3559_v58, %v1529_v41  ;;  %v1349_v54 = vadd.f32 %v3611_v49, %v1315_v47  ;;  %v1351_v42 = vadd.f32 %v3611_v49, %v1317_v18  ;;  %v2556_v59 = vld [vmem:[%s3060_s13 + $0x20] sm:$0xff]  ;;  %v2557_v18 = vld [vmem:[%s3060_s13 + $0x28] sm:$0xff] }
 0x1a6   : > { %v1890_v38 = vadd.f32 %v4233_v14, %v1889_v8  ;;  %v1938_v19 = vpop.f32.mrf.mxu3  ;;  %v1976_v10 = vadd.f32 %v2552_v32, %v1937_v37  ;;  %v1250_v36 = vmul.f32 %v1218_v22, %v4071_v61  ;;  %v1252_v28 = vmul.f32 %v1220_v30, %v4185_v34 }
 0x1a7   : > { %v1569_v24 = vadd.f32 %v3559_v58, %v1531_v3  ;;  %v1599_v20 = vmul.f32 %v1567_v29, %v4071_v61  ;;  %v2553_v58 = vld [vmem:[%s3060_s13 + $0x8] sm:$0xff] }
 0x1a8   : > { %v1939_v40 = vadd.f32 %v1938_v19, %v1890_v38  ;;  %v2545_v45 = vpop.eup %2544  ;;  %1992 = vst [vmem:[%s4259_s19] sm:$0xff] %v1976_v10  ;;  %v1284_v35 = vadd.f32 %v3574_v11, %v1250_v36  ;;  %v1286_v46 = vadd.f32 %v3574_v11, %v1252_v28  ;;  %v2558_v38 = vld [vmem:[%s3060_s13 + $0x30] sm:$0xff]  ;;  %v2559_v10 = vld [vmem:[%s3060_s13 + $0x38] sm:$0xff] }
 0x1a9   : > { %v1601_v51 = vmul.f32 %v1569_v24, %v4185_v34  ;;  %v1631_v1 = vand.u32 2147483647, %v1599_v20  ;;  %v1726_v57 = vmul.f32 %v2545_v45, %v1349_v54 }
 0x1aa   : > { %v2547_v39 = vpop.eup %2546  ;;  %v1977_v5 = vadd.f32 %v2553_v58, %v1939_v40  ;;  %v1316_v23 = vmul.f32 %v1284_v35, %v4071_v61  ;;  %v1318_v56 = vmul.f32 %v1286_v46, %v4185_v34  ;;  %v2554_v34 = vld [vmem:[%s3060_s13 + $0x10] sm:$0xff] }
 0x1ab   : > { %v1728_v55 = vmul.f32 %v2547_v39, %v1351_v42  ;;  %v1633_v17 = vand.u32 2147483647, %v1601_v51  ;;  %v1663_v49 = vadd.f32 1.0, %v1631_v1  ;;  %v2560_v39 = vld [vmem:[%s3060_s13 + $0x40] sm:$0xff] }
 0x1ac   : > { %1993 = vst [vmem:[%s4259_s19 + $0x8] sm:$0xff] %v1977_v5  ;;  %v1350_v60 = vadd.f32 %v3622_v62, %v1316_v23  ;;  %v1352_v16 = vadd.f32 %v3622_v62, %v1318_v56 }
 0x1ad   : > { %v1744_v2 = vpack.c.bf16 %v1728_v55, %v1726_v57  ;;  %v1665_v50 = vadd.f32 1.0, %v1633_v17  ;;  %2548 = vrcp.f32 %v1663_v49  ;;  %v2561_v57 = vld [vmem:[%s3060_s13 + $0x48] sm:$0xff] }
 0x1ae   : > { %v1892_v7 = vpop.f32.mrf.mxu2 }
 0x1af   : > { %1921 = vmatmul.bf16.gmra.mxu2 %v1744_v2  ;;  %2550 = vrcp.f32 %v1665_v50  ;;  %v1893_v11 = vadd.f32 %v4233_v14, %v1892_v7  ;;  %v2562_v50 = vld [vmem:[%s3060_s13 + $0x50] sm:$0xff] }
 0x1b3   : > { %v2549_v53 = vpop.eup %2548 }
 0x1b4   : > { %v1727_v13 = vmul.f32 %v2549_v53, %v1350_v60  ;;  %v2563_v60 = vld [vmem:[%s3060_s13 + $0x58] sm:$0xff] }
 0x1b5   : > { %v2551_v6 = vpop.eup %2550 }
 0x1b6   : > { %v1729_v33 = vmul.f32 %v2551_v6, %v1352_v16  ;;  %v1894_v61 = vpop.f32.mrf.mxu2 }
 0x1b7   : > { %v1895_v52 = vadd.f32 %v4233_v14, %v1894_v61 }
 0x1b8   : > { %v1745_v12 = vpack.c.bf16 %v1729_v33, %v1727_v13 }
 0x1b9   : > { %v1941_v44 = vpop.f32.mrf.mxu3 }
 0x1ba   : > { %v1942_v27 = vadd.f32 %v1941_v44, %v1893_v11  ;;  %1970 = vmatmul.bf16.gmra.mxu3 %v1745_v12  ;;  %v2564_v44 = vld [vmem:[%s3060_s13 + $0x60] sm:$0xff] }
 0x1bc   : > { %v1978_v43 = vadd.f32 %v2554_v34, %v1942_v27 }
 0x1be   : > { %1994 = vst [vmem:[%s4259_s19 + $0x10] sm:$0xff] %v1978_v43 }
 0x1c1   : > { %v1943_v62 = vpop.f32.mrf.mxu3 }
 0x1c2   : > { %v1944_v0 = vadd.f32 %v1943_v62, %v1895_v52  ;;  %v2565_v52 = vld [vmem:[%s3060_s13 + $0x68] sm:$0xff] }
 0x1c4   : > { %v1979_v9 = vadd.f32 %v2555_v25, %v1944_v0  ;;  %v1897_v21 = vpop.f32.mrf.mxu2 }
 0x1c5   : > { %v1898_v31 = vadd.f32 %v4233_v14, %v1897_v21 }
 0x1c6   : > { %1995 = vst [vmem:[%s4259_s19 + $0x18] sm:$0xff] %v1979_v9 }
 0x1cc   : > { %v1899_v4 = vpop.f32.mrf.mxu2 }
 0x1cd   : > { %v1900_v41 = vadd.f32 %v4233_v14, %v1899_v4 }
 0x1ce   : > { %v1946_v63 = vpop.f32.mrf.mxu3 }
 0x1cf   : > { %v1947_v26 = vadd.f32 %v1946_v63, %v1898_v31  ;;  %v2566_v63 = vld [vmem:[%s3060_s13 + $0x70] sm:$0xff] }
 0x1d1   : > { %v1980_v48 = vadd.f32 %v2556_v59, %v1947_v26 }
 0x1d3   : > { %1996 = vst [vmem:[%s4259_s19 + $0x20] sm:$0xff] %v1980_v48 }
 0x1d6   : > { %v1948_v15 = vpop.f32.mrf.mxu3 }
 0x1d7   : > { %v1949_v47 = vadd.f32 %v1948_v15, %v1900_v41  ;;  %v2567_v41 = vld [vmem:[%s3060_s13 + $0x78] sm:$0xff] }
 0x1d9   : > { %v1981_v22 = vadd.f32 %v2557_v18, %v1949_v47 }
 0x1db   : > { %1997 = vst [vmem:[%s4259_s19 + $0x28] sm:$0xff] %v1981_v22  ;;  %v1902_v30 = vpop.f32.mrf.mxu2 }
 0x1dc   : > { %v1903_v8 = vadd.f32 %v4233_v14, %v1902_v30 }
 0x1e3   : > { %v1904_v37 = vpop.f32.mrf.mxu2 }
 0x1e4   : > { %v1905_v24 = vadd.f32 %v4233_v14, %v1904_v37 }
 0x1e5   : > { %v1951_v3 = vpop.f32.mrf.mxu3 }
 0x1e6   : > { %v1952_v29 = vadd.f32 %v1951_v3, %v1903_v8 }
 0x1e8   : > { %v1982_v19 = vadd.f32 %v2558_v38, %v1952_v29 }
 0x1ea   : > { %1998 = vst [vmem:[%s4259_s19 + $0x30] sm:$0xff] %v1982_v19 }
 0x1ed   : > { %v1953_v20 = vpop.f32.mrf.mxu3 }
 0x1ee   : > { %v1954_v32 = vadd.f32 %v1953_v20, %v1905_v24 }
 0x1f0   : > { %v1983_v40 = vadd.f32 %v2559_v10, %v1954_v32 }
 0x1f1   : > { %v1907_v45 = vpop.f32.mrf.mxu2 }
 0x1f2   : > { %1999 = vst [vmem:[%s4259_s19 + $0x38] sm:$0xff] %v1983_v40  ;;  %v1908_v54 = vadd.f32 %v4233_v14, %v1907_v45 }
 0x1f9   : > { %v1909_v28 = vpop.f32.mrf.mxu2 }
 0x1fa   : > { %v1910_v1 = vadd.f32 %v4233_v14, %v1909_v28 }
 0x1fd   : > { %v1956_v42 = vpop.f32.mrf.mxu3 }
 0x1fe   : > { %v1957_v36 = vadd.f32 %v1956_v42, %v1908_v54 }
 0x200   : > { %v1984_v51 = vadd.f32 %v2560_v39, %v1957_v36 }
 0x202   : > { %2000 = vst [vmem:[%s4259_s19 + $0x40] sm:$0xff] %v1984_v51 }
 0x205   : > { %v1958_v58 = vpop.f32.mrf.mxu3 }
 0x206   : > { %v1959_v5 = vadd.f32 %v1958_v58, %v1910_v1 }
 0x207   : > { %v1912_v17 = vpop.f32.mrf.mxu2 }
 0x208   : > { %v1985_v55 = vadd.f32 %v2561_v57, %v1959_v5  ;;  %v1913_v49 = vadd.f32 %v4233_v14, %v1912_v17 }
 0x20a   : > { %2001 = vst [vmem:[%s4259_s19 + $0x48] sm:$0xff] %v1985_v55 }
 0x20f   : > { %v1914_v46 = vpop.f32.mrf.mxu2 }
 0x210   : > { %v1915_v56 = vadd.f32 %v4233_v14, %v1914_v46 }
 0x213   : > { %v1961_v2 = vpop.f32.mrf.mxu3 }
 0x214   : > { %v1962_v35 = vadd.f32 %v1961_v2, %v1913_v49 }
 0x216   : > { %v1986_v23 = vadd.f32 %v2562_v50, %v1962_v35 }
 0x218   : > { %2002 = vst [vmem:[%s4259_s19 + $0x50] sm:$0xff] %v1986_v23 }
 0x21b   : > { %v1963_v7 = vpop.f32.mrf.mxu3 }
 0x21c   : > { %v1964_v53 = vadd.f32 %v1963_v7, %v1915_v56  ;;  %v1917_v6 = vpop.f32.mrf.mxu2 }
 0x21d   : > { %v1918_v11 = vadd.f32 %v4233_v14, %v1917_v6 }
 0x21e   : > { %v1987_v16 = vadd.f32 %v2563_v60, %v1964_v53 }
 0x220   : > { %2003 = vst [vmem:[%s4259_s19 + $0x58] sm:$0xff] %v1987_v16 }
 0x224   : > { %v1919_v12 = vpop.f32.mrf.mxu2 }
 0x225   : > { %v1920_v61 = vadd.f32 %v4233_v14, %v1919_v12 }
 0x228   : > { %v1966_v13 = vpop.f32.mrf.mxu3 }
 0x229   : > { %v1967_v33 = vadd.f32 %v1966_v13, %v1918_v11 }
 0x22b   : > { %v1988_v27 = vadd.f32 %v2564_v44, %v1967_v33 }
 0x22d   : > { %2004 = vst [vmem:[%s4259_s19 + $0x60] sm:$0xff] %v1988_v27 }
 0x230   : > { %v1968_v34 = vpop.f32.mrf.mxu3 }
 0x231   : > { %v1969_v43 = vadd.f32 %v1968_v34, %v1920_v61 }
 0x232   : > { %v1922_v0 = vpop.f32.mrf.mxu2 }
 0x233   : > { %v1989_v62 = vadd.f32 %v2565_v52, %v1969_v43  ;;  %v1923_v25 = vadd.f32 %v4233_v14, %v1922_v0 }
 0x235   : > { %2005 = vst [vmem:[%s4259_s19 + $0x68] sm:$0xff] %v1989_v62 }
 0x23a   : > { %v1924_v31 = vpop.f32.mrf.mxu2 }
 0x23b   : > { %v1925_v4 = vadd.f32 %v4233_v14, %v1924_v31 }
 0x23d   : > { %v1971_v9 = vpop.f32.mrf.mxu3 }
 0x23e   : > { %v1972_v21 = vadd.f32 %v1971_v9, %v1923_v25 }
 0x240   : > { %v1990_v26 = vadd.f32 %v2566_v63, %v1972_v21 }
 0x242   : > { %2006 = vst [vmem:[%s4259_s19 + $0x70] sm:$0xff] %v1990_v26 }
 0x245   : > { %v1973_v59 = vpop.f32.mrf.mxu3 }
 0x246   : > { %v1974_v48 = vadd.f32 %v1973_v59, %v1925_v4 }
 0x248   : > { %v1991_v15 = vadd.f32 %v2567_v41, %v1974_v48 }
 0x24a   : > { %2007 = vst [vmem:[%s4259_s19 + $0x78] sm:$0xff] %v1991_v15 }
 0x24b   : > { %2805 = shalt.err (!%p2802_p9)
}
 0x24c   : > { %s2868_s15 = smov 128   ;;  %s2869_s13 = smov 8  }
 0x24d   : > { %2368 = dma.vmem_to_hbm [thread:$0]  (%p3020_p4), %s2022_s25, 2048, %s2024_s28, %s2009_s16, %s2868_s15, %s2868_s15, %s2869_s13  }
 0x24e PF: > { %s2038_s19 = sand.u32 1, %s2844_s30   ;;  %p4375_p10 = scmp.ge.s32.totalorder %s2856_s12, 2 }
 0x24f   : > { %s2039_s21 = scalar_lea.sflag [#allocation4], %s2038_s19 }
 0x250   : > { %p2394_p13 = pnand %p4375_p10, %p3024_p6 }
 0x252   : > { %p2395_p11 = pneg %p2394_p13 }
 0x254   : > { %2839 = dma.done.wait (%p2395_p11), %s2039_s21, 2048  }
 0x255   : > { %2841 = vsyncadd (%p2395_p11), %s2039_s21, 4294965248  ;;  %p25_p0 = scmp.ge.s32.totalorder %s2994_s24, 4   ;;  %s4376_s30 = smov %s2848_s10 }
 0x256   : > { %s4377_s10 = smov %s2852_s11  ;;  %s4378_s11 = smov %s3005_s22 }
 0x257   : > { %s4379_s12 = smov %s2994_s24  ;;  %27 = sbr.rel (!%p25_p0) target bundleno = 13 (0xd), region = 125 }
 0x25c   :  { %2045 = vsyncpa [#allocation3], 1 }
 0x25d   :  { %2047 = vsyncpa [#allocation3 + $0x1], 1 }
 0x25e   :  { %2048 = vsyncpa [#allocation6], 1 }
 0x25f   :  { %2049 = vsyncpa [#allocation9], 1 }
 0x260   :  { %2050 = vsyncpa [#allocation12], 1 }
 0x261   :  { %2051 = vsyncpa [#allocation4], 1 }
 0x262   :  { %2053 = vsyncpa [#allocation4 + $0x1], 1 }

</bundles_post_ra>
